<compile_context>
chip_gen: v7x
topology: tpu7x:2x2x1
jax: 0.10.0
libtpu: 0.0.40
codegen_flags: <defaults>
</compile_context>

<pallas_src>
import jax
import jax.numpy as jnp
import numpy as np
from jax import lax
from jax.experimental import pallas as pl
from jax.experimental.pallas import tpu as pltpu

NUM_STEPS = 2


def _r128(x):
    return ((x + 127) // 128) * 128


def _round_up(x, m):
    return ((x + m - 1) // m) * m


def _make_kernel(H, L, E, R, SEG, offs):
    off_escore = offs["e_score"]
    off_ent = offs["ent"]
    off_word = offs["word"]
    off_rel = offs["rel"]
    off_hop = offs["hop"]
    HI = jax.lax.Precision.HIGHEST

    def kernel(q_emb_ref, q_word_ref, mask_ref, heads_ref,
               w_qfused_ref, b_qfused_ref, w_rel_ref, b_rel_ref,
               msubj_ref, mrel_ref, mobj_ref, packed_ref):
        # Zero the packed output tile once; pad lanes stay zero.
        packed_ref[...] = jnp.zeros_like(packed_ref)

        q_emb = q_emb_ref[...]
        q_word = q_word_ref[...]
        mask = mask_ref[...]
        last_e = heads_ref[...]
        msubj = msubj_ref[...]
        mrel = mrel_ref[...]
        mobj = mobj_ref[...]

        # Fused q_emb projection: both step encoders + hop selector in one MXU
        # matmul.  Segments are 128-lane aligned, so slices below are shift-free.
        fused = (
            jnp.dot(q_emb, w_qfused_ref[...],
                    preferred_element_type=jnp.float32, precision=HI)
            + b_qfused_ref[...]
        )                                                              # (Bt, WF)

        hop_logit = fused[:, NUM_STEPS * SEG: NUM_STEPS * SEG + NUM_STEPS]
        h_exp = jnp.exp(hop_logit - jnp.max(hop_logit, axis=1, keepdims=True))
        hop_attn = h_exp / jnp.sum(h_exp, axis=1, keepdims=True)       # (Bt, S)

        e_score = jnp.zeros_like(last_e)
        for t in range(NUM_STEPS):
            cq_t = jnp.tanh(fused[:, t * SEG: t * SEG + H])            # (Bt, H)

            # Word-attention logits: VPU multiply + reduce over H
            # (avoids per-batch M=1 MXU matmuls).
            q_logits = jnp.sum(cq_t[:, None, :] * q_word, axis=2)      # (Bt, L)
            q_exp = jnp.exp(q_logits - jnp.max(q_logits, axis=1, keepdims=True))
            q_dist = q_exp / jnp.sum(q_exp, axis=1, keepdims=True)
            q_dist = q_dist * mask
            q_dist = q_dist / (jnp.sum(q_dist, axis=1, keepdims=True) + 1e-6)
            packed_ref[:, off_word[t]: off_word[t] + L] = q_dist

            # Context vector: VPU multiply + reduce over L.
            ctx_h = jnp.sum(q_dist[:, :, None] * q_word, axis=1)       # (Bt, H)

            rel_logit = (
                jnp.dot(ctx_h, w_rel_ref[...],
                        preferred_element_type=jnp.float32, precision=HI)
                + b_rel_ref[...]
            )                                                          # (Bt, R)
            rel_dist = 1.0 / (1.0 + jnp.exp(-rel_logit))               # exact sigmoid
            packed_ref[:, off_rel[t]: off_rel[t] + R] = rel_dist

            # follow(e, r), transpose-free: B on sublanes, T/E on lanes.
            x = lax.dot_general(
                last_e, msubj,
                dimension_numbers=(((1,), (1,)), ((), ())),
                preferred_element_type=jnp.float32, precision=HI,
            ) * lax.dot_general(
                rel_dist, mrel,
                dimension_numbers=(((1,), (1,)), ((), ())),
                preferred_element_type=jnp.float32, precision=HI,
            )                                                          # (Bt, T)
            last_e = jnp.dot(x, mobj,
                             preferred_element_type=jnp.float32, precision=HI)

            # Exact >1 clamp: e / max(e, 1) == e / (m*e + (1-m)) since e >= 0.
            last_e = last_e / jnp.maximum(last_e, 1.0)
            packed_ref[:, off_ent[t]: off_ent[t] + E] = last_e

            e_score = e_score + last_e * hop_attn[:, t: t + 1]

        packed_ref[:, off_escore: off_escore + E] = e_score
        packed_ref[:, off_hop: off_hop + NUM_STEPS] = hop_attn

    return kernel


def graph_reasoning_forward(q_emb, q_word, mask, heads, params, msubj, mrel, mobj):
    B, H = q_emb.shape
    L = q_word.shape[1]
    E = heads.shape[1]
    R = params["w_rel"].shape[1]
    T = msubj.shape[0]

    # --- fuse q_emb-only projections with 128-lane-aligned segments ---
    SEG = _r128(H)
    WF = NUM_STEPS * SEG + _r128(NUM_STEPS)
    w_qfused = jnp.zeros((H, WF), jnp.float32)
    b_qfused = jnp.zeros((1, WF), jnp.float32)
    for t in range(NUM_STEPS):
        w_qfused = w_qfused.at[:, t * SEG: t * SEG + H].set(params["w_step"][t])
        b_qfused = b_qfused.at[:, t * SEG: t * SEG + H].set(params["b_step"][t])
    w_qfused = w_qfused.at[:, NUM_STEPS * SEG: NUM_STEPS * SEG + NUM_STEPS].set(
        params["w_hop"])
    b_qfused = b_qfused.at[:, NUM_STEPS * SEG: NUM_STEPS * SEG + NUM_STEPS].set(
        params["b_hop"])

    # --- packed-output layout: every field starts on a 128-lane boundary ---
    offs = {"ent": [], "word": [], "rel": []}
    cur = 0
    offs["e_score"] = cur; cur += _r128(E)
    for _ in range(NUM_STEPS):
        offs["ent"].append(cur); cur += _r128(E)
    for _ in range(NUM_STEPS):
        offs["word"].append(cur); cur += _r128(L)
    for _ in range(NUM_STEPS):
        offs["rel"].append(cur); cur += _r128(R)
    offs["hop"] = cur; cur += _r128(NUM_STEPS)
    PACK = cur

    # --- batch padding / tiling: grid over B ("parallel" feeds both v7x TCs) ---
    B_pad = _round_up(max(B, 8), 8)
    B_TILE = min(B_pad, 128)
    B_pad = _round_up(B_pad, B_TILE)

    def pad_b(x):
        p = B_pad - x.shape[0]
        if p == 0:
            return x
        return jnp.concatenate(
            [x, jnp.zeros((p,) + x.shape[1:], x.dtype)], axis=0)

    q_emb_p = pad_b(q_emb.astype(jnp.float32))
    q_word_p = pad_b(q_word.astype(jnp.float32))
    mask_p = pad_b(mask.astype(jnp.float32))
    heads_p = pad_b(heads.astype(jnp.float32))

    # Per-generation VMEM budget (fallback is safe for interpret / unknown HW).
    try:
        vmem_cap = int(pltpu.get_tpu_info().vmem_capacity_bytes)
    except Exception:
        vmem_cap = 64 << 20
    vmem_limit = int(min(max(vmem_cap - (16 << 20), 32 << 20), 100 << 20))

    kernel = _make_kernel(H, L, E, R, SEG, offs)

    grid = (B_pad // B_TILE,)
    # Batch-tiled operands.
    tiled_specs = [
        pl.BlockSpec((B_TILE, H), lambda b: (b, 0)),        # q_emb
        pl.BlockSpec((B_TILE, L, H), lambda b: (b, 0, 0)),  # q_word
        pl.BlockSpec((B_TILE, L), lambda b: (b, 0)),        # mask
        pl.BlockSpec((B_TILE, E), lambda b: (b, 0)),        # heads
    ]
    # Resident operands (constant index_map -> DMA'd once, live in VMEM).
    resident_specs = [
        pl.BlockSpec((H, WF), lambda b: (0, 0)),            # w_qfused
        pl.BlockSpec((1, WF), lambda b: (0, 0)),            # b_qfused
        pl.BlockSpec((H, R), lambda b: (0, 0)),             # w_rel
        pl.BlockSpec((1, R), lambda b: (0, 0)),             # b_rel
        pl.BlockSpec((T, E), lambda b: (0, 0)),             # msubj
        pl.BlockSpec((T, R), lambda b: (0, 0)),             # mrel
        pl.BlockSpec((T, E), lambda b: (0, 0)),             # mobj
    ]

    fn = pl.pallas_call(
        kernel,
        out_shape=jax.ShapeDtypeStruct((B_pad, PACK), jnp.float32),
        grid=grid,
        in_specs=tiled_specs + resident_specs,
        out_specs=pl.BlockSpec((B_TILE, PACK), lambda b: (b, 0)),
        compiler_params=pltpu.CompilerParams(
            dimension_semantics=("parallel",),
            vmem_limit_bytes=vmem_limit,
        ),
    )
    packed = fn(
        q_emb_p, q_word_p, mask_p, heads_p,
        w_qfused, b_qfused,
        params["w_rel"].astype(jnp.float32), params["b_rel"].astype(jnp.float32),
        msubj.astype(jnp.float32), mrel.astype(jnp.float32), mobj.astype(jnp.float32),
    )

    packed = packed[:B]  # strip batch padding
    e_score = packed[:, offs["e_score"]: offs["e_score"] + E]
    ent_probs = jnp.stack([packed[:, o: o + E] for o in offs["ent"]], axis=0)
    word_attns = jnp.stack([packed[:, o: o + L] for o in offs["word"]], axis=0)
    rel_probs = jnp.stack([packed[:, o: o + R] for o in offs["rel"]], axis=0)
    hop_attn = packed[:, offs["hop"]: offs["hop"] + NUM_STEPS]
    return e_score, word_attns, rel_probs, ent_probs, hop_attn


def reference_forward(q_emb, q_word, mask, heads, params, msubj, mrel, mobj):
    """Pure-JAX reference mirroring the PyTorch forward (eval mode)."""
    with jax.default_matmul_precision("highest"):
        last_e = heads
        ent_probs = []
        for t in range(NUM_STEPS):
            cq = jnp.tanh(q_emb @ params["w_step"][t] + params["b_step"][t])
            q_logits = jnp.sum(cq[:, None, :] * q_word, axis=2)
            q_dist = jax.nn.softmax(q_logits, axis=1)
            q_dist = q_dist * mask
            q_dist = q_dist / (jnp.sum(q_dist, axis=1, keepdims=True) + 1e-6)
            ctx = jnp.einsum("bl,blh->bh", q_dist, q_word)
            rel = jax.nn.sigmoid(ctx @ params["w_rel"] + params["b_rel"])
            x = (msubj @ last_e.T) * (mrel @ rel.T)
            last_e = (mobj.T @ x).T
            m = (last_e > 1.0).astype(jnp.float32)
            last_e = last_e / (m * last_e + (1.0 - m))
            ent_probs.append(last_e)
        hop = jax.nn.softmax(q_emb @ params["w_hop"] + params["b_hop"], axis=1)
        hop_res = jnp.stack(ent_probs, axis=1)
        return jnp.sum(hop_res * hop[:, :, None], axis=1)


if __name__ == "__main__":
    key = jax.random.PRNGKey(0)
    B, L, H, E, R, T = 2, 8, 32, 16, 8, 32

    ks = jax.random.split(key, 12)

    q_emb = jax.random.normal(ks[0], (B, H), dtype=jnp.float32)
    q_word = jax.random.normal(ks[1], (B, L, H), dtype=jnp.float32)
    mask = (jax.random.uniform(ks[2], (B, L)) > 0.2).astype(jnp.float32)
    mask = mask.at[:, 0].set(1.0)  # keep at least one valid token per row

    # heads: one-hot starting entities
    head_idx = jax.random.randint(ks[3], (B,), 0, E)
    heads = jax.nn.one_hot(head_idx, E, dtype=jnp.float32)

    # synthetic triples -> dense incidence matrices
    subj = jax.random.randint(ks[4], (T,), 0, E)
    rel = jax.random.randint(ks[5], (T,), 0, R)
    obj = jax.random.randint(ks[6], (T,), 0, E)
    msubj = jax.nn.one_hot(subj, E, dtype=jnp.float32)  # (T, E)
    mrel = jax.nn.one_hot(rel, R, dtype=jnp.float32)    # (T, R)
    mobj = jax.nn.one_hot(obj, E, dtype=jnp.float32)    # (T, E)

    s = 1.0 / np.sqrt(H)
    params = {
        "w_step": jax.random.uniform(ks[7], (NUM_STEPS, H, H), minval=-s, maxval=s),
        "b_step": jax.random.uniform(ks[8], (NUM_STEPS, 1, H), minval=-s, maxval=s),
        "w_rel": jax.random.uniform(ks[9], (H, R), minval=-s, maxval=s),
        "b_rel": jax.random.uniform(ks[10], (1, R), minval=-s, maxval=s),
        "w_hop": jax.random.uniform(ks[11], (H, NUM_STEPS), minval=-s, maxval=s),
        "b_hop": jnp.zeros((1, NUM_STEPS), dtype=jnp.float32),
    }
    params = {k: v.astype(jnp.float32) for k, v in params.items()}

    e_score, word_attns, rel_probs, ent_probs, hop_attn = jax.block_until_ready(
        graph_reasoning_forward(q_emb, q_word, mask, heads, params, msubj, mrel, mobj)
    )

    ref = jax.block_until_ready(
        reference_forward(q_emb, q_word, mask, heads, params, msubj, mrel, mobj)
    )
    # Exact-arithmetic kernel (no approximate reciprocals) -> tight tolerance.
    np.testing.assert_allclose(np.asarray(e_score), np.asarray(ref),
                               rtol=5e-4, atol=1e-5)

    print("KERNEL_OK")
</pallas_src>

<mosaic_0001>
module attributes {stable_mosaic.version = 11 : i64} {
  func.func @kernel(%arg0: i32, %arg1: memref<8x32xf32, #tpu.memory_space<vmem>>, %arg2: memref<8x8x32xf32, #tpu.memory_space<vmem>>, %arg3: memref<8x8xf32, #tpu.memory_space<vmem>>, %arg4: memref<8x16xf32, #tpu.memory_space<vmem>>, %arg5: memref<32x384xf32, #tpu.memory_space<vmem>>, %arg6: memref<1x384xf32, #tpu.memory_space<vmem>>, %arg7: memref<32x8xf32, #tpu.memory_space<vmem>>, %arg8: memref<1x8xf32, #tpu.memory_space<vmem>>, %arg9: memref<32x16xf32, #tpu.memory_space<vmem>>, %arg10: memref<32x8xf32, #tpu.memory_space<vmem>>, %arg11: memref<32x16xf32, #tpu.memory_space<vmem>>, %arg12: memref<8x1024xf32, #tpu.memory_space<vmem>>) attributes {dimension_semantics = [#tpu.dimension_semantics<parallel>], iteration_bounds = array<i64: 1>, scalar_prefetch = 0 : i64, scratch_operands = 0 : i64, tpu.core_type = #tpu.core_type<tc>, window_params = [{transform_indices = @transform_0, window_bounds = array<i64: 8, 32>}, {transform_indices = @transform_1, window_bounds = array<i64: 8, 8, 32>}, {transform_indices = @transform_2, window_bounds = array<i64: 8, 8>}, {transform_indices = @transform_3, window_bounds = array<i64: 8, 16>}, {pipeline_mode = #tpu.pipeline_mode<synchronous>, transform_indices = @transform_4, window_bounds = array<i64: 32, 384>}, {pipeline_mode = #tpu.pipeline_mode<synchronous>, transform_indices = @transform_5, window_bounds = array<i64: 1, 384>}, {pipeline_mode = #tpu.pipeline_mode<synchronous>, transform_indices = @transform_6, window_bounds = array<i64: 32, 8>}, {pipeline_mode = #tpu.pipeline_mode<synchronous>, transform_indices = @transform_7, window_bounds = array<i64: 1, 8>}, {pipeline_mode = #tpu.pipeline_mode<synchronous>, transform_indices = @transform_8, window_bounds = array<i64: 32, 16>}, {pipeline_mode = #tpu.pipeline_mode<synchronous>, transform_indices = @transform_9, window_bounds = array<i64: 32, 8>}, {pipeline_mode = #tpu.pipeline_mode<synchronous>, transform_indices = @transform_10, window_bounds = array<i64: 32, 16>}, {transform_indices = @transform_11, window_bounds = array<i64: 8, 1024>}]} {
    %cst = arith.constant 0.000000e+00 : f32
    %0 = vector.broadcast %cst : f32 to vector<8x1024xf32>
    %c0 = arith.constant 0 : index
    %c0_0 = arith.constant 0 : index
    %1 = vector.load %arg12[%c0, %c0_0] : memref<8x1024xf32, #tpu.memory_space<vmem>>, vector<8x1024xf32>
    tpu.vector_store %arg12[%c0, %c0_0], %0 {strides = array<i32>} : memref<8x1024xf32, #tpu.memory_space<vmem>>, vector<8x1024xf32>,
    %c0_1 = arith.constant 0 : index
    %c0_2 = arith.constant 0 : index
    %2 = vector.load %arg1[%c0_1, %c0_2] : memref<8x32xf32, #tpu.memory_space<vmem>>, vector<8x32xf32>
    %c0_3 = arith.constant 0 : index
    %c0_4 = arith.constant 0 : index
    %c0_5 = arith.constant 0 : index
    %3 = vector.load %arg2[%c0_3, %c0_4, %c0_5] : memref<8x8x32xf32, #tpu.memory_space<vmem>>, vector<8x8x32xf32>
    %c0_6 = arith.constant 0 : index
    %c0_7 = arith.constant 0 : index
    %4 = vector.load %arg3[%c0_6, %c0_7] : memref<8x8xf32, #tpu.memory_space<vmem>>, vector<8x8xf32>
    %c0_8 = arith.constant 0 : index
    %c0_9 = arith.constant 0 : index
    %5 = vector.load %arg4[%c0_8, %c0_9] : memref<8x16xf32, #tpu.memory_space<vmem>>, vector<8x16xf32>
    %c0_10 = arith.constant 0 : index
    %c0_11 = arith.constant 0 : index
    %6 = vector.load %arg9[%c0_10, %c0_11] : memref<32x16xf32, #tpu.memory_space<vmem>>, vector<32x16xf32>
    %c0_12 = arith.constant 0 : index
    %c0_13 = arith.constant 0 : index
    %7 = vector.load %arg10[%c0_12, %c0_13] : memref<32x8xf32, #tpu.memory_space<vmem>>, vector<32x8xf32>
    %c0_14 = arith.constant 0 : index
    %c0_15 = arith.constant 0 : index
    %8 = vector.load %arg11[%c0_14, %c0_15] : memref<32x16xf32, #tpu.memory_space<vmem>>, vector<32x16xf32>
    %c0_16 = arith.constant 0 : index
    %c0_17 = arith.constant 0 : index
    %9 = vector.load %arg5[%c0_16, %c0_17] : memref<32x384xf32, #tpu.memory_space<vmem>>, vector<32x384xf32>
    %cst_18 = arith.constant dense<0.000000e+00> : vector<8x384xf32>
    %10 = tpu.matmul %2, %9, %cst_18 {dimension_numbers = #tpu.dot_dimension_numbers<[1], [0], [0], [1], [0, 0, 1, 1], [], []>, precision = #tpu.contract_precision<fp32>} : vector<8x32xf32>, vector<32x384xf32>, vector<8x384xf32> -> vector<8x384xf32>
    %c0_19 = arith.constant 0 : index
    %c0_20 = arith.constant 0 : index
    %11 = vector.load %arg6[%c0_19, %c0_20] : memref<1x384xf32, #tpu.memory_space<vmem>>, vector<1x384xf32>
    %12 = vector.broadcast %11 : vector<1x384xf32> to vector<8x384xf32>
    %13 = arith.addf %10, %12 : vector<8x384xf32>
    %14 = vector.extract_strided_slice %13 {offsets = [0, 256], sizes = [8, 2], strides = [1, 1]} : vector<8x384xf32> to vector<8x2xf32>
    %cst_21 = arith.constant dense<0xFF800000> : vector<8xf32>
    %15 = vector.multi_reduction <maximumf>, %14, %cst_21 [1] : vector<8x2xf32> to vector<8xf32>
    %16 = vector.shape_cast %15 : vector<8xf32> to vector<8x1xf32>
    %17 = vector.broadcast %16 : vector<8x1xf32> to vector<8x2xf32>
    %18 = arith.subf %14, %17 : vector<8x2xf32>
    %19 = math.exp %18 : vector<8x2xf32>
    %cst_22 = arith.constant dense<0.000000e+00> : vector<8xf32>
    %20 = vector.multi_reduction <add>, %19, %cst_22 [1] : vector<8x2xf32> to vector<8xf32>
    %21 = vector.shape_cast %20 : vector<8xf32> to vector<8x1xf32>
    %22 = vector.broadcast %21 : vector<8x1xf32> to vector<8x2xf32>
    %23 = arith.divf %19, %22 : vector<8x2xf32>
    %cst_23 = arith.constant 0.000000e+00 : f32
    %24 = vector.broadcast %cst_23 : f32 to vector<8x16xf32>
    %25 = vector.extract_strided_slice %13 {offsets = [0, 0], sizes = [8, 32], strides = [1, 1]} : vector<8x384xf32> to vector<8x32xf32>
    %26 = math.tanh %25 : vector<8x32xf32>
    %27 = vector.shape_cast %26 : vector<8x32xf32> to vector<8x1x32xf32>
    %28 = vector.broadcast %27 : vector<8x1x32xf32> to vector<8x8x32xf32>
    %29 = arith.mulf %28, %3 : vector<8x8x32xf32>
    %cst_24 = arith.constant dense<0.000000e+00> : vector<8x8xf32>
    %30 = vector.multi_reduction <add>, %29, %cst_24 [2] : vector<8x8x32xf32> to vector<8x8xf32>
    %cst_25 = arith.constant dense<0xFF800000> : vector<8xf32>
    %31 = vector.multi_reduction <maximumf>, %30, %cst_25 [1] : vector<8x8xf32> to vector<8xf32>
    %32 = vector.shape_cast %31 : vector<8xf32> to vector<8x1xf32>
    %33 = vector.broadcast %32 : vector<8x1xf32> to vector<8x8xf32>
    %34 = arith.subf %30, %33 : vector<8x8xf32>
    %35 = math.exp %34 : vector<8x8xf32>
    %cst_26 = arith.constant dense<0.000000e+00> : vector<8xf32>
    %36 = vector.multi_reduction <add>, %35, %cst_26 [1] : vector<8x8xf32> to vector<8xf32>
    %37 = vector.shape_cast %36 : vector<8xf32> to vector<8x1xf32>
    %38 = vector.broadcast %37 : vector<8x1xf32> to vector<8x8xf32>
    %39 = arith.divf %35, %38 : vector<8x8xf32>
    %40 = arith.mulf %39, %4 : vector<8x8xf32>
    %cst_27 = arith.constant dense<0.000000e+00> : vector<8xf32>
    %41 = vector.multi_reduction <add>, %40, %cst_27 [1] : vector<8x8xf32> to vector<8xf32>
    %42 = vector.shape_cast %41 : vector<8xf32> to vector<8x1xf32>
    %cst_28 = arith.constant 9.99999997E-7 : f32
    %43 = vector.broadcast %cst_28 : f32 to vector<8x1xf32>
    %44 = arith.addf %42, %43 : vector<8x1xf32>
    %45 = vector.broadcast %44 : vector<8x1xf32> to vector<8x8xf32>
    %46 = arith.divf %40, %45 : vector<8x8xf32>
    %c0_29 = arith.constant 0 : index
    %c384 = arith.constant 384 : index
    %47 = vector.load %arg12[%c0_29, %c384] : memref<8x1024xf32, #tpu.memory_space<vmem>>, vector<8x8xf32>
    tpu.vector_store %arg12[%c0_29, %c384], %46 {strides = array<i32>} : memref<8x1024xf32, #tpu.memory_space<vmem>>, vector<8x8xf32>,
    %48 = vector.shape_cast %46 : vector<8x8xf32> to vector<8x8x1xf32>
    %49 = vector.broadcast %48 : vector<8x8x1xf32> to vector<8x8x32xf32>
    %50 = arith.mulf %49, %3 : vector<8x8x32xf32>
    %cst_30 = arith.constant dense<0.000000e+00> : vector<8x32xf32>
    %51 = vector.multi_reduction <add>, %50, %cst_30 [1] : vector<8x8x32xf32> to vector<8x32xf32>
    %c0_31 = arith.constant 0 : index
    %c0_32 = arith.constant 0 : index
    %52 = vector.load %arg7[%c0_31, %c0_32] : memref<32x8xf32, #tpu.memory_space<vmem>>, vector<32x8xf32>
    %cst_33 = arith.constant dense<0.000000e+00> : vector<8x8xf32>
    %53 = tpu.matmul %51, %52, %cst_33 {dimension_numbers = #tpu.dot_dimension_numbers<[1], [0], [0], [1], [0, 0, 1, 1], [], []>, precision = #tpu.contract_precision<fp32>} : vector<8x32xf32>, vector<32x8xf32>, vector<8x8xf32> -> vector<8x8xf32>
    %c0_34 = arith.constant 0 : index
    %c0_35 = arith.constant 0 : index
    %54 = vector.load %arg8[%c0_34, %c0_35] : memref<1x8xf32, #tpu.memory_space<vmem>>, vector<1x8xf32>
    %55 = vector.broadcast %54 : vector<1x8xf32> to vector<8x8xf32>
    %56 = arith.addf %53, %55 : vector<8x8xf32>
    %cst_36 = arith.constant 0.000000e+00 : f32
    %57 = vector.broadcast %cst_36 : f32 to vector<8x8xf32>
    %58 = arith.subf %57, %56 : vector<8x8xf32>
    %59 = math.exp %58 : vector<8x8xf32>
    %cst_37 = arith.constant 1.000000e+00 : f32
    %60 = vector.broadcast %cst_37 : f32 to vector<8x8xf32>
    %61 = arith.addf %60, %59 : vector<8x8xf32>
    %cst_38 = arith.constant 1.000000e+00 : f32
    %62 = vector.broadcast %cst_38 : f32 to vector<8x8xf32>
    %63 = arith.divf %62, %61 : vector<8x8xf32>
    %c0_39 = arith.constant 0 : index
    %c640 = arith.constant 640 : index
    %64 = vector.load %arg12[%c0_39, %c640] : memref<8x1024xf32, #tpu.memory_space<vmem>>, vector<8x8xf32>
    tpu.vector_store %arg12[%c0_39, %c640], %63 {strides = array<i32>} : memref<8x1024xf32, #tpu.memory_space<vmem>>, vector<8x8xf32>,
    %cst_40 = arith.constant dense<0.000000e+00> : vector<8x32xf32>
    %65 = tpu.matmul %5, %6, %cst_40 {dimension_numbers = #tpu.dot_dimension_numbers<[1], [1], [0], [0], [0, 0, 1, 0], [], []>, precision = #tpu.contract_precision<fp32>} : vector<8x16xf32>, vector<32x16xf32>, vector<8x32xf32> -> vector<8x32xf32>
    %cst_41 = arith.constant dense<0.000000e+00> : vector<8x32xf32>
    %66 = tpu.matmul %63, %7, %cst_41 {dimension_numbers = #tpu.dot_dimension_numbers<[1], [1], [0], [0], [0, 0, 1, 0], [], []>, precision = #tpu.contract_precision<fp32>} : vector<8x8xf32>, vector<32x8xf32>, vector<8x32xf32> -> vector<8x32xf32>
    %67 = arith.mulf %65, %66 : vector<8x32xf32>
    %cst_42 = arith.constant dense<0.000000e+00> : vector<8x16xf32>
    %68 = tpu.matmul %67, %8, %cst_42 {dimension_numbers = #tpu.dot_dimension_numbers<[1], [0], [0], [1], [0, 0, 1, 1], [], []>, precision = #tpu.contract_precision<fp32>} : vector<8x32xf32>, vector<32x16xf32>, vector<8x16xf32> -> vector<8x16xf32>
    %cst_43 = arith.constant 1.000000e+00 : f32
    %69 = vector.broadcast %cst_43 : f32 to vector<8x16xf32>
    %70 = arith.maximumf %68, %69 : vector<8x16xf32>
    %71 = arith.divf %68, %70 : vector<8x16xf32>
    %c0_44 = arith.constant 0 : index
    %c128 = arith.constant 128 : index
    %72 = vector.load %arg12[%c0_44, %c128] : memref<8x1024xf32, #tpu.memory_space<vmem>>, vector<8x16xf32>
    tpu.vector_store %arg12[%c0_44, %c128], %71 {strides = array<i32>} : memref<8x1024xf32, #tpu.memory_space<vmem>>, vector<8x16xf32>,
    %73 = vector.extract_strided_slice %23 {offsets = [0, 0], sizes = [8, 1], strides = [1, 1]} : vector<8x2xf32> to vector<8x1xf32>
    %74 = vector.broadcast %73 : vector<8x1xf32> to vector<8x16xf32>
    %75 = arith.mulf %71, %74 : vector<8x16xf32>
    %76 = arith.addf %24, %75 : vector<8x16xf32>
    %77 = vector.extract_strided_slice %13 {offsets = [0, 128], sizes = [8, 32], strides = [1, 1]} : vector<8x384xf32> to vector<8x32xf32>
    %78 = math.tanh %77 : vector<8x32xf32>
    %79 = vector.shape_cast %78 : vector<8x32xf32> to vector<8x1x32xf32>
    %80 = vector.broadcast %79 : vector<8x1x32xf32> to vector<8x8x32xf32>
    %81 = arith.mulf %80, %3 : vector<8x8x32xf32>
    %cst_45 = arith.constant dense<0.000000e+00> : vector<8x8xf32>
    %82 = vector.multi_reduction <add>, %81, %cst_45 [2] : vector<8x8x32xf32> to vector<8x8xf32>
    %cst_46 = arith.constant dense<0xFF800000> : vector<8xf32>
    %83 = vector.multi_reduction <maximumf>, %82, %cst_46 [1] : vector<8x8xf32> to vector<8xf32>
    %84 = vector.shape_cast %83 : vector<8xf32> to vector<8x1xf32>
    %85 = vector.broadcast %84 : vector<8x1xf32> to vector<8x8xf32>
    %86 = arith.subf %82, %85 : vector<8x8xf32>
    %87 = math.exp %86 : vector<8x8xf32>
    %cst_47 = arith.constant dense<0.000000e+00> : vector<8xf32>
    %88 = vector.multi_reduction <add>, %87, %cst_47 [1] : vector<8x8xf32> to vector<8xf32>
    %89 = vector.shape_cast %88 : vector<8xf32> to vector<8x1xf32>
    %90 = vector.broadcast %89 : vector<8x1xf32> to vector<8x8xf32>
    %91 = arith.divf %87, %90 : vector<8x8xf32>
    %92 = arith.mulf %91, %4 : vector<8x8xf32>
    %cst_48 = arith.constant dense<0.000000e+00> : vector<8xf32>
    %93 = vector.multi_reduction <add>, %92, %cst_48 [1] : vector<8x8xf32> to vector<8xf32>
    %94 = vector.shape_cast %93 : vector<8xf32> to vector<8x1xf32>
    %cst_49 = arith.constant 9.99999997E-7 : f32
    %95 = vector.broadcast %cst_49 : f32 to vector<8x1xf32>
    %96 = arith.addf %94, %95 : vector<8x1xf32>
    %97 = vector.broadcast %96 : vector<8x1xf32> to vector<8x8xf32>
    %98 = arith.divf %92, %97 : vector<8x8xf32>
    %c0_50 = arith.constant 0 : index
    %c512 = arith.constant 512 : index
    %99 = vector.load %arg12[%c0_50, %c512] : memref<8x1024xf32, #tpu.memory_space<vmem>>, vector<8x8xf32>
    tpu.vector_store %arg12[%c0_50, %c512], %98 {strides = array<i32>} : memref<8x1024xf32, #tpu.memory_space<vmem>>, vector<8x8xf32>,
    %100 = vector.shape_cast %98 : vector<8x8xf32> to vector<8x8x1xf32>
    %101 = vector.broadcast %100 : vector<8x8x1xf32> to vector<8x8x32xf32>
    %102 = arith.mulf %101, %3 : vector<8x8x32xf32>
    %cst_51 = arith.constant dense<0.000000e+00> : vector<8x32xf32>
    %103 = vector.multi_reduction <add>, %102, %cst_51 [1] : vector<8x8x32xf32> to vector<8x32xf32>
    %c0_52 = arith.constant 0 : index
    %c0_53 = arith.constant 0 : index
    %104 = vector.load %arg7[%c0_52, %c0_53] : memref<32x8xf32, #tpu.memory_space<vmem>>, vector<32x8xf32>
    %cst_54 = arith.constant dense<0.000000e+00> : vector<8x8xf32>
    %105 = tpu.matmul %103, %104, %cst_54 {dimension_numbers = #tpu.dot_dimension_numbers<[1], [0], [0], [1], [0, 0, 1, 1], [], []>, precision = #tpu.contract_precision<fp32>} : vector<8x32xf32>, vector<32x8xf32>, vector<8x8xf32> -> vector<8x8xf32>
    %c0_55 = arith.constant 0 : index
    %c0_56 = arith.constant 0 : index
    %106 = vector.load %arg8[%c0_55, %c0_56] : memref<1x8xf32, #tpu.memory_space<vmem>>, vector<1x8xf32>
    %107 = vector.broadcast %106 : vector<1x8xf32> to vector<8x8xf32>
    %108 = arith.addf %105, %107 : vector<8x8xf32>
    %cst_57 = arith.constant 0.000000e+00 : f32
    %109 = vector.broadcast %cst_57 : f32 to vector<8x8xf32>
    %110 = arith.subf %109, %108 : vector<8x8xf32>
    %111 = math.exp %110 : vector<8x8xf32>
    %cst_58 = arith.constant 1.000000e+00 : f32
    %112 = vector.broadcast %cst_58 : f32 to vector<8x8xf32>
    %113 = arith.addf %112, %111 : vector<8x8xf32>
    %cst_59 = arith.constant 1.000000e+00 : f32
    %114 = vector.broadcast %cst_59 : f32 to vector<8x8xf32>
    %115 = arith.divf %114, %113 : vector<8x8xf32>
    %c0_60 = arith.constant 0 : index
    %c768 = arith.constant 768 : index
    %116 = vector.load %arg12[%c0_60, %c768] : memref<8x1024xf32, #tpu.memory_space<vmem>>, vector<8x8xf32>
    tpu.vector_store %arg12[%c0_60, %c768], %115 {strides = array<i32>} : memref<8x1024xf32, #tpu.memory_space<vmem>>, vector<8x8xf32>,
    %cst_61 = arith.constant dense<0.000000e+00> : vector<8x32xf32>
    %117 = tpu.matmul %71, %6, %cst_61 {dimension_numbers = #tpu.dot_dimension_numbers<[1], [1], [0], [0], [0, 0, 1, 0], [], []>, precision = #tpu.contract_precision<fp32>} : vector<8x16xf32>, vector<32x16xf32>, vector<8x32xf32> -> vector<8x32xf32>
    %cst_62 = arith.constant dense<0.000000e+00> : vector<8x32xf32>
    %118 = tpu.matmul %115, %7, %cst_62 {dimension_numbers = #tpu.dot_dimension_numbers<[1], [1], [0], [0], [0, 0, 1, 0], [], []>, precision = #tpu.contract_precision<fp32>} : vector<8x8xf32>, vector<32x8xf32>, vector<8x32xf32> -> vector<8x32xf32>
    %119 = arith.mulf %117, %118 : vector<8x32xf32>
    %cst_63 = arith.constant dense<0.000000e+00> : vector<8x16xf32>
    %120 = tpu.matmul %119, %8, %cst_63 {dimension_numbers = #tpu.dot_dimension_numbers<[1], [0], [0], [1], [0, 0, 1, 1], [], []>, precision = #tpu.contract_precision<fp32>} : vector<8x32xf32>, vector<32x16xf32>, vector<8x16xf32> -> vector<8x16xf32>
    %cst_64 = arith.constant 1.000000e+00 : f32
    %121 = vector.broadcast %cst_64 : f32 to vector<8x16xf32>
    %122 = arith.maximumf %120, %121 : vector<8x16xf32>
    %123 = arith.divf %120, %122 : vector<8x16xf32>
    %c0_65 = arith.constant 0 : index
    %c256 = arith.constant 256 : index
    %124 = vector.load %arg12[%c0_65, %c256] : memref<8x1024xf32, #tpu.memory_space<vmem>>, vector<8x16xf32>
    tpu.vector_store %arg12[%c0_65, %c256], %123 {strides = array<i32>} : memref<8x1024xf32, #tpu.memory_space<vmem>>, vector<8x16xf32>,
    %125 = vector.extract_strided_slice %23 {offsets = [0, 1], sizes = [8, 1], strides = [1, 1]} : vector<8x2xf32> to vector<8x1xf32>
    %126 = vector.broadcast %125 : vector<8x1xf32> to vector<8x16xf32>
    %127 = arith.mulf %123, %126 : vector<8x16xf32>
    %128 = arith.addf %76, %127 : vector<8x16xf32>
    %c0_66 = arith.constant 0 : index
    %c0_67 = arith.constant 0 : index
    %129 = vector.load %arg12[%c0_66, %c0_67] : memref<8x1024xf32, #tpu.memory_space<vmem>>, vector<8x16xf32>
    tpu.vector_store %arg12[%c0_66, %c0_67], %128 {strides = array<i32>} : memref<8x1024xf32, #tpu.memory_space<vmem>>, vector<8x16xf32>,
    %c0_68 = arith.constant 0 : index
    %c896 = arith.constant 896 : index
    %130 = vector.load %arg12[%c0_68, %c896] : memref<8x1024xf32, #tpu.memory_space<vmem>>, vector<8x2xf32>
    tpu.vector_store %arg12[%c0_68, %c896], %23 {strides = array<i32>} : memref<8x1024xf32, #tpu.memory_space<vmem>>, vector<8x2xf32>,
    return
  }
  func.func @transform_0(%arg0: i32) -> (i32, i32) {
    %c0_i32 = arith.constant 0 : i32
    %c0_i32_0 = arith.constant 0 : i32
    return %arg0, %c0_i32 : i32, i32
  }
  func.func @transform_1(%arg0: i32) -> (i32, i32, i32) {
    %c0_i32 = arith.constant 0 : i32
    %c0_i32_0 = arith.constant 0 : i32
    %c0_i32_1 = arith.constant 0 : i32
    return %arg0, %c0_i32, %c0_i32_0 : i32, i32, i32
  }
  func.func @transform_2(%arg0: i32) -> (i32, i32) {
    %c0_i32 = arith.constant 0 : i32
    %c0_i32_0 = arith.constant 0 : i32
    return %arg0, %c0_i32 : i32, i32
  }
  func.func @transform_3(%arg0: i32) -> (i32, i32) {
    %c0_i32 = arith.constant 0 : i32
    %c0_i32_0 = arith.constant 0 : i32
    return %arg0, %c0_i32 : i32, i32
  }
  func.func @transform_4(%arg0: i32) -> (i32, i32) {
    %c0_i32 = arith.constant 0 : i32
    %c0_i32_0 = arith.constant 0 : i32
    %c0_i32_1 = arith.constant 0 : i32
    return %c0_i32, %c0_i32_0 : i32, i32
  }
  func.func @transform_5(%arg0: i32) -> (i32, i32) {
    %c0_i32 = arith.constant 0 : i32
    %c0_i32_0 = arith.constant 0 : i32
    %c0_i32_1 = arith.constant 0 : i32
    return %c0_i32, %c0_i32_0 : i32, i32
  }
  func.func @transform_6(%arg0: i32) -> (i32, i32) {
    %c0_i32 = arith.constant 0 : i32
    %c0_i32_0 = arith.constant 0 : i32
    %c0_i32_1 = arith.constant 0 : i32
    return %c0_i32, %c0_i32_0 : i32, i32
  }
  func.func @transform_7(%arg0: i32) -> (i32, i32) {
    %c0_i32 = arith.constant 0 : i32
    %c0_i32_0 = arith.constant 0 : i32
    %c0_i32_1 = arith.constant 0 : i32
    return %c0_i32, %c0_i32_0 : i32, i32
  }
  func.func @transform_8(%arg0: i32) -> (i32, i32) {
    %c0_i32 = arith.constant 0 : i32
    %c0_i32_0 = arith.constant 0 : i32
    %c0_i32_1 = arith.constant 0 : i32
    return %c0_i32, %c0_i32_0 : i32, i32
  }
  func.func @transform_9(%arg0: i32) -> (i32, i32) {
    %c0_i32 = arith.constant 0 : i32
    %c0_i32_0 = arith.constant 0 : i32
    %c0_i32_1 = arith.constant 0 : i32
    return %c0_i32, %c0_i32_0 : i32, i32
  }
  func.func @transform_10(%arg0: i32) -> (i32, i32) {
    %c0_i32 = arith.constant 0 : i32
    %c0_i32_0 = arith.constant 0 : i32
    %c0_i32_1 = arith.constant 0 : i32
    return %c0_i32, %c0_i32_0 : i32, i32
  }
  func.func @transform_11(%arg0: i32) -> (i32, i32) {
    %c0_i32 = arith.constant 0 : i32
    %c0_i32_0 = arith.constant 0 : i32
    return %arg0, %c0_i32 : i32, i32
  }
}

</mosaic_0001>

<bundles_post_ra>
// kernel: tpu_custom_call.1
= control target key start
LH: loop header
LB: loop body
LE: loop exit
PB: predicated region body
PF: predicated region fallthrough
CT: control target
= control target key end

     0   :  { %16 = vsyncpa [#allocation3], 0  ;;  %s9692_s0 = inlined_call_operand.hbm [shape: f32[8,32], index: 0, kind: input, shape index: {}]   ;;  %s9693_s1 = inlined_call_operand.vmem [shape: f32[8,8,32], index: 1, kind: input, shape index: {}]   ;;  %s9694_s2 = inlined_call_operand.hbm [shape: f32[8,8], index: 2, kind: input, shape index: {}]   ;;  %s9695_s3 = inlined_call_operand.hbm [shape: f32[8,16], index: 3, kind: input, shape index: {}]   ;;  %s9696_s4 = inlined_call_operand.vmem [shape: f32[32,384], index: 4, kind: input, shape index: {}]   ;;  %s9697_s5 = inlined_call_operand.hbm [shape: f32[1,384], index: 5, kind: input, shape index: {}]   ;;  %s9698_s6 = inlined_call_operand.vmem [shape: f32[32,8], index: 6, kind: input, shape index: {}]   ;;  %s9699_s7 = inlined_call_operand.vmem [shape: f32[1,8], index: 7, kind: input, shape index: {}]   ;;  %s9700_s8 = inlined_call_operand.vmem [shape: f32[32,16], index: 8, kind: input, shape index: {}]   ;;  %s9701_s9 = inlined_call_operand.vmem [shape: f32[32,8], index: 9, kind: input, shape index: {}]   ;;  %s9702_s10 = inlined_call_operand.vmem [shape: f32[32,16], index: 10, kind: input, shape index: {}]   ;;  %s9703_s11 = inlined_call_operand.hbm [shape: f32[8,1024], index: 11, kind: output, shape index: {}]  }
   0x1   :  { %17 = vsyncpa [#allocation6], 0 }
   0x2   :  { %18 = vsyncpa [#allocation9], 0 }
   0x3   :  { %19 = vsyncpa [#allocation4], 0  ;;  %s8217_s17 = smov [#allocation5]   ;;  %s8218_s19 = smov [#allocation2]  }
   0x4   :  { %s38_s18 = sshll.u32 %s8217_s17, 4  ;;  %s26_s20 = sshll.u32 %s8218_s19, 4  ;;  %s39_s18 = int_to_ptr.vmem [resolvable:$true] %s38_s18  ;;  %s27_s20 = int_to_ptr.vmem [resolvable:$true] %s26_s20 }
   0x5   :  { %s8099_s23 = scalar_lea.hbm %s9694_s2, 128 }
   0x6   :  { %p8100_p0 = scmp.ne.s32.totalorder %s9694_s2, %s8099_s23  ;;  %p8103_p1 = scmp.lt.u32.totalorder %s8099_s23, %s9694_s2 }
   0x8   :  { %p8105_p2 = pnand %p8103_p1, %p8100_p0 }
   0xa   :  { %8108 = shalt.err (!%p8105_p2)
}
   0xb   :  { %s8109_s28 = scalar_lea.vmem %s39_s18, 128  ;;  %p8114_p4 = scmp.lt.s32.totalorder %s39_s18, %s39_s18 }
   0xc   :  { %p8110_p3 = scmp.ne.s32.totalorder %s39_s18, %s8109_s28  ;;  %p8115_p5 = scmp.lt.s32.totalorder %s8109_s28, %s8109_s28 }
   0xe   :  { %p8116_p6 = por %p8115_p5, %p8114_p4 }
  0x10   :  { %p8117_p7 = pnand %p8116_p6, %p8110_p3 }
  0x12   :  { %8120 = shalt.err (!%p8117_p7)
}
  0x13   :  { %41 = dma.hbm_to_vmem [thread:$0]  %s9694_s2, 128, %s39_s18, [#allocation6]  }
  0x14   :  { %s8121_s14 = scalar_lea.hbm %s9692_s0, 128 }
  0x15   :  { %p8122_p8 = scmp.ne.s32.totalorder %s9692_s0, %s8121_s14  ;;  %p8125_p9 = scmp.lt.u32.totalorder %s8121_s14, %s9692_s0 }
  0x17   :  { %p8127_p10 = pnand %p8125_p9, %p8122_p8 }
  0x19   :  { %8130 = shalt.err (!%p8127_p10)
}
  0x1a   :  { %s8131_s21 = scalar_lea.vmem %s27_s20, 128  ;;  %p8136_p12 = scmp.lt.s32.totalorder %s27_s20, %s27_s20 }
  0x1b   :  { %p8132_p11 = scmp.ne.s32.totalorder %s27_s20, %s8131_s21  ;;  %p8137_p13 = scmp.lt.s32.totalorder %s8131_s21, %s8131_s21 }
  0x1d   :  { %p8138_p0 = por %p8137_p13, %p8136_p12 }
  0x1f   :  { %p8139_p1 = pnand %p8138_p0, %p8132_p11 }
  0x21   :  { %8142 = shalt.err (!%p8139_p1)
}
  0x22   :  { %29 = dma.hbm_to_vmem [thread:$0]  %s9692_s0, 128, %s27_s20, [#allocation3]  }
  0x23   :  { %s8219_s22 = smov [#allocation7]   ;;  %s8220_s24 = smov [#allocation8]  }
  0x24   :  { %s48_s23 = sshll.u32 %s8219_s22, 4  ;;  %s60_s25 = sshll.u32 %s8220_s24, 4  ;;  %s49_s23 = int_to_ptr.vmem [resolvable:$true] %s48_s23  ;;  %s61_s25 = int_to_ptr.vmem [resolvable:$true] %s60_s25 }
  0x25   :  { %s8143_s28 = scalar_lea.hbm %s9695_s3, 128 }
  0x26   :  { %p8144_p2 = scmp.ne.s32.totalorder %s9695_s3, %s8143_s28  ;;  %p8147_p3 = scmp.lt.u32.totalorder %s8143_s28, %s9695_s3 }
  0x28   :  { %p8149_p4 = pnand %p8147_p3, %p8144_p2 }
  0x2a   :  { %8152 = shalt.err (!%p8149_p4)
}
  0x2b   :  { %s8153_s0 = scalar_lea.vmem %s49_s23, 128  ;;  %p8158_p6 = scmp.lt.s32.totalorder %s49_s23, %s49_s23 }
  0x2c   :  { %p8154_p5 = scmp.ne.s32.totalorder %s49_s23, %s8153_s0  ;;  %p8159_p7 = scmp.lt.s32.totalorder %s8153_s0, %s8153_s0 }
  0x2e   :  { %p8160_p8 = por %p8159_p7, %p8158_p6 }
  0x30   :  { %p8161_p9 = pnand %p8160_p8, %p8154_p5 }
  0x32   :  { %8164 = shalt.err (!%p8161_p9)
}
  0x33   :  { %51 = dma.hbm_to_vmem [thread:$0]  %s9695_s3, 128, %s49_s23, [#allocation6]  }
  0x34   :  { %s8165_s17 = scalar_lea.hbm %s9697_s5, 48 }
  0x35   :  { %p8166_p10 = scmp.ne.s32.totalorder %s9697_s5, %s8165_s17  ;;  %p8169_p11 = scmp.lt.u32.totalorder %s8165_s17, %s9697_s5 }
  0x37   :  { %p8171_p12 = pnand %p8169_p11, %p8166_p10 }
  0x39   :  { %8174 = shalt.err (!%p8171_p12)
}
  0x3a   :  { %s8175_s22 = scalar_lea.vmem %s61_s25, 48  ;;  %s8179_s24 = scalar_lea.vmem %s61_s25, 64 }
  0x3b   :  { %p8176_p13 = scmp.ne.s32.totalorder %s61_s25, %s8175_s22  ;;  %p8180_p0 = scmp.lt.s32.totalorder %s61_s25, %s61_s25 }
  0x3c   :  { %p8181_p1 = scmp.lt.s32.totalorder %s8179_s24, %s8175_s22 }
  0x3e   :  { %p8182_p2 = por %p8181_p1, %p8180_p0 }
  0x40   :  { %p8183_p3 = pnand %p8182_p2, %p8176_p13 }
  0x42   :  { %8186 = shalt.err (!%p8183_p3)
}
  0x43   :  { %63 = dma.hbm_to_vmem [thread:$0]  %s9697_s5, 48, %s61_s25, [#allocation9]  }
  0x44   :  { %8209 = dma.done.wait [#allocation3], 128  }
  0x45   :  { %8210 = vsyncadd [#allocation3], 4294967168 }
  0x46   :  { %8211 = dma.done.wait [#allocation6], 256  }
  0x47   :  { %8212 = vsyncadd [#allocation6], 4294967040 }
  0x48   :  { %8213 = dma.done.wait [#allocation9], 48  }
  0x49   :  { %8214 = vsyncadd [#allocation9], 4294967248  ;;  %v8221_v0 = vmov 0.0   ;;  %v118_v1 = vld [vmem:[%s9696_s4 + $0x8] sm:$0xff]  ;;  %v121_v2 = vld [vmem:[%s9696_s4 + $0x20] sm:$0xff]  ;;  %vm146_vm0 = vcmask 261120  }
  0x4a   :  { %222 = vmatprep.mubr.f32.mxu0 %v8221_v0  ;;  %86 = vst [vmem:[#allocation10] sm:$0xff] %v8221_v0  ;;  %87 = vst [vmem:[#allocation10 + $0x8] sm:$0xff] %v8221_v0  ;;  %v117_v3 = vld [vmem:[%s9696_s4] sm:$0xff]  ;;  %v150_v4 = vand.u32 4294901760, %v118_v1  ;;  %v154_v5 = vand.u32 4294901760, %v121_v2  ;;  %v120_v6 = vld [vmem:[%s9696_s4 + $0x18] sm:$0xff] }
  0x4b   :  { %88 = vst [vmem:[#allocation10 + $0x10] sm:$0xff] %v8221_v0  ;;  %89 = vst [vmem:[#allocation10 + $0x18] sm:$0xff] %v8221_v0  ;;  %v152_v7 = vand.u32 4294901760, %v117_v3  ;;  %v124_v8 = vld [vmem:[%s9696_s4 + $0x38] sm:$0xff]  ;;  %v127_v9 = vld [vmem:[%s9696_s4 + $0x50] sm:$0xff]  ;;  %v156_v10 = vand.u32 4294901760, %v120_v6 }
  0x4c   :  { %90 = vst [vmem:[#allocation10 + $0x20] sm:$0xff] %v8221_v0  ;;  %91 = vst [vmem:[#allocation10 + $0x28] sm:$0xff] %v8221_v0  ;;  %v158_v11 = vand.u32 4294901760, %v124_v8  ;;  %v162_v12 = vand.u32 4294901760, %v127_v9  ;;  %v123_v13 = vld [vmem:[%s9696_s4 + $0x30] sm:$0xff]  ;;  %v126_v14 = vld [vmem:[%s9696_s4 + $0x48] sm:$0xff]  ;;  %v8369_v16 = vpack.c.bf16 %v154_v5, %v150_v4  ;;  %v8371_v17 = vsub.f32 %v118_v1, %v150_v4 }
  0x4d   :  { %92 = vst [vmem:[#allocation10 + $0x30] sm:$0xff] %v8221_v0  ;;  %93 = vst [vmem:[#allocation10 + $0x38] sm:$0xff] %v8221_v0  ;;  %v94_v15 = vld [vmem:[#allocation2] sm:$0xff]  ;;  %v8373_v18 = vsub.f32 %v121_v2, %v154_v5  ;;  %v8375_v19 = vsub.f32 %v117_v3, %v152_v7  ;;  %v8377_v20 = vpack.c.bf16 %v156_v10, %v152_v7  ;;  %v160_v25 = vand.u32 4294901760, %v123_v13 }
  0x4e   :  { %v8379_v21 = vsub.f32 %v120_v6, %v156_v10  ;;  %v8381_v22 = vpack.c.bf16 %v162_v12, %v158_v11  ;;  %v8383_v23 = vsub.f32 %v124_v8, %v158_v11  ;;  %7481 = vmatprep.subr.bf16.mxu0 %v8369_v16  ;;  %v8386_v24 = vsub.f32 %v127_v9, %v162_v12  ;;  %v129_v12 = vld [vmem:[#allocation8] sm:$0x7] }
  0x4f   :  { %v164_v26 = vand.u32 4294901760, %v126_v14  ;;  %v148_v27 = vsel %vm146_vm0, %v94_v15, 0  ;;  %7483 = vmatpush1.bf16.msra.mxu0 %v8377_v20  ;;  %v236_v29 = vand.u32 4294901760, %v8371_v17  ;;  %v248_v30 = vand.u32 4294901760, %v8373_v18 }
  0x50   :  { %v8390_v28 = vand.u32 4294901760, %v148_v27  ;;  %v242_v31 = vand.u32 4294901760, %v8375_v19  ;;  %7485 = vmatprep.subr.bf16.mxu0 %v8381_v22  ;;  %v265_v33 = vsub.f32 %v123_v13, %v160_v25  ;;  %v254_v35 = vand.u32 4294901760, %v8379_v21 }
  0x51   :  { %v8396_v32 = vpack.c.bf16 %v164_v26, %v160_v25  ;;  %v277_v34 = vsub.f32 %v126_v14, %v164_v26  ;;  %v237_v37 = vsub.f32 %v8371_v17, %v236_v29  ;;  %v249_v38 = vsub.f32 %v8373_v18, %v248_v30 }
  0x52   :  { %v8400_v36 = vsub.f32 %v148_v27, %v8390_v28  ;;  %v243_v39 = vsub.f32 %v8375_v19, %v242_v31  ;;  %v255_v40 = vsub.f32 %v8379_v21, %v254_v35  ;;  %v260_v41 = vand.u32 4294901760, %v8383_v23 }
  0x53   :  { %v272_v42 = vand.u32 4294901760, %v8386_v24  ;;  %v266_v43 = vand.u32 4294901760, %v265_v33  ;;  %7487 = vmatpush1.bf16.msra.mxu0 %v8396_v32  ;;  %v238_v45 = vand.u32 4294901760, %v237_v37  ;;  %v250_v46 = vand.u32 4294901760, %v249_v38 }
  0x54   :  { %v8410_v44 = vand.u32 4294901760, %v8400_v36  ;;  %v244_v47 = vand.u32 4294901760, %v243_v39  ;;  %v256_v48 = vand.u32 4294901760, %v255_v40  ;;  %v261_v49 = vsub.f32 %v8383_v23, %v260_v41 }
  0x55   :  { %v273_v50 = vsub.f32 %v8386_v24, %v272_v42  ;;  %v267_v51 = vsub.f32 %v265_v33, %v266_v43  ;;  %v7488_v53 = vpack.c.bf16 %v250_v46, %v238_v45  ;;  %v278_v54 = vand.u32 4294901760, %v277_v34  ;;  %v8471_v45 = vld [vmem:[%s9693_s1 + $0x8] sm:$0xff] }
  0x56   :  { %v226_v52 = vsub.f32 %v8400_v36, %v8410_v44  ;;  %v7490_v55 = vpack.c.bf16 %v256_v48, %v244_v47  ;;  %v262_v56 = vand.u32 4294901760, %v261_v49  ;;  %v7496_v1 = vpack.c.bf16 %v8373_v18, %v8371_v17 }
  0x57   :  { %v274_v57 = vand.u32 4294901760, %v273_v50  ;;  %7489 = vmatprep.subr.bf16.mxu0 %v7488_v53  ;;  %v268_v59 = vand.u32 4294901760, %v267_v51  ;;  %v279_v60 = vsub.f32 %v277_v34, %v278_v54  ;;  %v7498_v2 = vpack.c.bf16 %v8379_v21, %v8375_v19 }
  0x58   :  { %v8416_v58 = vand.u32 4294901760, %v226_v52  ;;  %v7500_v3 = vpack.c.bf16 %v8386_v24, %v8383_v23  ;;  %v7502_v4 = vpack.c.bf16 %v277_v34, %v265_v33  ;;  %v7512_v5 = vpack.c.bf16 %v248_v30, %v236_v29  ;;  %v8458_v34 = vld [vmem:[%s9693_s1] sm:$0xff]  ;;  %v8481_v52 = vld [vmem:[%s9693_s1 + $0x18] sm:$0xff] }
  0x59   :  { %v7492_v61 = vpack.c.bf16 %v274_v57, %v262_v56  ;;  %v280_v62 = vand.u32 4294901760, %v279_v60  ;;  %v7514_v6 = vpack.c.bf16 %v254_v35, %v242_v31  ;;  %v7516_v7 = vpack.c.bf16 %v272_v42, %v260_v41 }
  0x5a   :  { %228 = vmatmul.mubr.f32.vlgmr.msra.gmra.mrb[0].mxu0 %v8416_v58  ;;  %v7518_v8 = vpack.c.bf16 %v278_v54, %v266_v43  ;;  %v131_v9 = vlaneseq  ;;  %v8466_v43 = vld [vmem:[%s9693_s1 + $0x10] sm:$0xff]  ;;  %vm1355_vm1 = vcmask 1041409   ;;  %vm1357_vm2 = vcmask 1042434  }
  0x5b   :  { %7491 = vmatpush1.bf16.msra.mxu0 %v7490_v55  ;;  %338 = vmatprep.mubr.f32.mxu0 %v8221_v0  ;;  %v7494_v63 = vpack.c.bf16 %v280_v62, %v268_v59  ;;  %vm1359_vm3 = vcmask 1043459   ;;  %vm1361_vm4 = vcmask 1044484   ;;  %vm1363_vm5 = vcmask 1045509  }
  0x5c   :  { %7493 = vmatprep.subr.bf16.mxu0 %v7492_v61  ;;  %v8444_v10 = vshrl.u32 %v131_v9, 7  ;;  %v8491_v61 = vld [vmem:[%s9693_s1 + $0x20] sm:$0xff]  ;;  %vm1365_vm6 = vcmask 1046534   ;;  %vm1367_vm7 = vcmask 1047559   ;;  %vm1370_vm8 = vcmask 64512  }
  0x5d   :  { %vm8225_vm9 = vmmov 0   ;;  %vm2442_vm10 = vcmask 130048   ;;  %vm1178_vm11 = vcmask 15360  }
  0x5e   :  { %v8447_v11 = vsub.s32 0, %v8444_v10  ;;  %v8450_v13 = vsub.s32 1, %v8444_v10  ;;  %6894 = vmatprep.mubr.msk.f32.mxu1 %vm8225_vm9, %v8221_v0 }
  0x5f   :  { %7495 = vmatpush1.bf16.msra.mxu0 %v7494_v63 }
  0x60   :  { %7497 = vmatprep.subr.bf16.mxu0 %v7496_v1  ;;  %v134_v14 = vrot.slane %v129_v12, %v8447_v11  ;;  %v138_v15 = vrot.slane %v129_v12, %v8450_v13 }
  0x62   :  { %340 = vmatmul.mubr.f32.vlgmr.msra.gmra.mrb[0].mxu0 %v8390_v28 }
  0x63   :  { %7499 = vmatpush1.bf16.msra.mxu0 %v7498_v2  ;;  %426 = vmatprep.mubr.f32.mxu0 %v8221_v0 }
  0x64   :  { %7501 = vmatprep.subr.bf16.mxu0 %v7500_v3  ;;  %v8499_v3 = vld [vmem:[%s9693_s1 + $0x28] sm:$0xff] }
  0x67   :  { %7503 = vmatpush1.bf16.msra.mxu0 %v7502_v4 }
  0x68   :  { %7505 = vmatprep.subr.bf16.mxu0 %v8369_v16 }
  0x6a   :  { %429 = vmatmul.mubr.f32.vlgmr.msra.gmra.mrb[0].mxu0 %v8400_v36 }
  0x6b   :  { %7507 = vmatpush1.bf16.msra.mxu0 %v8377_v20  ;;  %507 = vmatprep.mubr.f32.mxu0 %v8221_v0 }
  0x6c   :  { %7509 = vmatprep.subr.bf16.mxu0 %v8381_v22 }
  0x6f   :  { %7511 = vmatpush1.bf16.msra.mxu0 %v8396_v32 }
  0x70   :  { %7513 = vmatprep.subr.bf16.mxu0 %v7512_v5 }
  0x72   :  { %511 = vmatmul.mubr.f32.vlgmr.msra.gmra.mrb[0].mxu0 %v8410_v44 }
  0x73   :  { %7515 = vmatpush1.bf16.msra.mxu0 %v7514_v6  ;;  %605 = vmatprep.mubr.f32.mxu0 %v8221_v0 }
  0x74   :  { %7517 = vmatprep.subr.bf16.mxu0 %v7516_v7 }
  0x77   :  { %7519 = vmatpush1.bf16.msra.mxu0 %v7518_v8  ;;  %v8509_v8 = vld [vmem:[%s9693_s1 + $0x30] sm:$0xff] }
  0x78   :  { %7521 = vmatprep.subr.bf16.mxu0 %v8369_v16 }
  0x7a   :  { %607 = vmatmul.mubr.f32.vlgmr.msra.gmra.mrb[0].mxu0 %v8390_v28 }
  0x7b   :  { %7523 = vmatpush1.bf16.msra.mxu0 %v8377_v20  ;;  %685 = vmatprep.mubr.f32.mxu0 %v8221_v0  ;;  %v8222_v20 = vmov 1966171168  }
  0x7c   :  { %7525 = vmatprep.subr.bf16.mxu0 %v8381_v22  ;;  %v1194_v21 = vunpack.c.l.s4 %v8222_v20 }
  0x7e   :  { %v1195_v22 = vunpack.c.0.s8 %v1194_v21 }
  0x7f   :  { %7527 = vmatpush1.bf16.msra.mxu0 %v8396_v32 }
  0x80   :  { %v1198_v23 = vsub.s32 %v1195_v22, %v8444_v10 }
  0x82   :  { %687 = vmatmul.mubr.f32.vlgmr.msra.gmra.mrb[0].mxu0 %v8390_v28 }
  0x83   :  { %6960 = vmatprep.mubr.msk.f32.mxu0 %vm8225_vm9, %v8221_v0 }
 0x155   :  { %v688_v16 = vpop.f32.mrb[0].mxu0 }
 0x156   :  { %v7852_v17 = vadd.f32 %v688_v16, %v134_v14  ;;  %v690_v18 = vpop.f32.mrb[1].mxu0 }
 0x157   :  { %v7853_v19 = vadd.f32 %v690_v18, %v138_v15 }
 0x158   :  { %7972 = vtanh.f32 %v7852_v17  ;;  %v8517_v17 = vld [vmem:[%s9693_s1 + $0x38] sm:$0xff] }
 0x159   :  { %7974 = vtanh.f32 %v7853_v19 }
 0x162   :  { %v7973_v24 = vpop.eup %7972 }
 0x163   :  { %v7975_v25 = vpop.eup %7974  ;;  %v1199_v26 = vrot.slane %v7973_v24, %v1198_v23  ;;  %v1192_v27 = vcombine.high %v7973_v24, %v7973_v24 }
 0x164   :  { %v3952_v29 = vrot.slane %v7975_v25, %v1198_v23  ;;  %v3945_v30 = vcombine.high %v7975_v25, %v7975_v25 }
 0x165   :  { %v1215_v31 = vrot.slane %v1199_v26, %v1198_v23  ;;  %v1207_v32 = vcombine.high %v1199_v26, %v1199_v26  ;;  %v1206_v33 = vrot.slane %v1192_v27, %v1198_v23  ;;  %v1322_v26 = vand.u32 127, %v131_v9 }
 0x166   :  { %v8460_v35 = vrot.slane %v3952_v29, %v1198_v23  ;;  %v3960_v37 = vcombine.high %v3952_v29, %v3952_v29  ;;  %v3959_v38 = vrot.slane %v3945_v30, %v1198_v23 }
 0x167   :  { %v1244_v39 = vrot.slane %v1215_v31, %v8447_v11  ;;  %v1237_v40 = vcombine.high %v1215_v31, %v1215_v31  ;;  %v1229_v41 = vrot.slane %v1207_v32, %v1198_v23  ;;  %v1222_v42 = vrot.slane %v1206_v33, %v1198_v23 }
 0x168   :  { %v1208_v46 = vcombine.high %v1206_v33, %v1206_v33  ;;  %v8473_v47 = vrot.slane %v3960_v37, %v1198_v23  ;;  %v8504_v7 = vrot.slane %v3959_v38, %v1198_v23  ;;  %v3961_v12 = vcombine.high %v3959_v38, %v3959_v38 }
 0x169   :  { %v1281_v48 = vmul.f32 %v1244_v39, %v8458_v34  ;;  %v1252_v49 = vrot.slane %v1237_v40, %v8447_v11  ;;  %v1248_v50 = vrot.slane %v1229_v41, %v8447_v11  ;;  %v1239_v51 = vcombine.high %v1229_v41, %v1229_v41 }
 0x16a   :  { %v1260_v53 = vrot.slane %v1222_v42, %v8447_v11  ;;  %v1236_v54 = vrot.slane %v1208_v46, %v1198_v23  ;;  %v1238_v55 = vcombine.high %v1222_v42, %v1222_v42  ;;  %v8519_v18 = vrot.slane %v3961_v12, %v1198_v23 }
 0x16b   :  { %v1289_v56 = vsel %vm146_vm0, %v1281_v48, 0.0  ;;  %v1283_v57 = vmul.f32 %v1252_v49, %v8466_v43  ;;  %v1282_v59 = vmul.f32 %v1248_v50, %v8471_v45  ;;  %v1256_v60 = vrot.slane %v1239_v51, %v8447_v11 }
 0x16c   :  { %1290 = vadd.xlane.f32.xlu0 %v1289_v56  ;;  %v1264_v1 = vrot.slane %v1236_v54, %v8447_v11  ;;  %v1240_v2 = vcombine.high %v1236_v54, %v1236_v54  ;;  %v1285_v5 = vmul.f32 %v1260_v53, %v8491_v61  ;;  %v1268_v6 = vrot.slane %v1238_v55, %v8447_v11 }
 0x16d   :  { %v1295_v62 = vsel %vm146_vm0, %v1283_v57, 0.0  ;;  %v1284_v63 = vmul.f32 %v1256_v60, %v8481_v52  ;;  %v1292_v4 = vsel %vm146_vm0, %v1282_v59, 0.0  ;;  %v8529_v27 = vsub.s32 %v1322_v26, %v8444_v10 }
 0x16e   :  { %1296 = vadd.xlane.f32.xlu1 %v1295_v62  ;;  %v1286_v15 = vmul.f32 %v1264_v1, %v8499_v3  ;;  %v1272_v16 = vrot.slane %v1240_v2, %v8447_v11  ;;  %v1301_v19 = vsel %vm146_vm0, %v1285_v5, 0.0  ;;  %v1287_v20 = vmul.f32 %v1268_v6, %v8509_v8 }
 0x16f   :  { %v1298_v14 = vsel %vm146_vm0, %v1284_v63, 0.0  ;;  %v8223_v60 = vmov 0   ;;  %v8548_v62 = vsub.s32 2, %v8444_v10  ;;  %v8551_v63 = vsub.s32 3, %v8444_v10 }
 0x170   :  { %1293 = vadd.xlane.f32.xlu0 %v1292_v4  ;;  %v1304_v21 = vsel %vm146_vm0, %v1286_v15, 0.0  ;;  %v1288_v22 = vmul.f32 %v1272_v16, %v8517_v17  ;;  %v1307_v24 = vsel %vm146_vm0, %v1287_v20, 0.0  ;;  %7968 = vset.pattern.permute.xlu1 %v8223_v60  ;;  %v8557_v6 = vsub.s32 4, %v8444_v10 }
 0x171   :  { %7969 = vset.pattern.permute.xlu0 %v8223_v60  ;;  %v8565_v26 = vsub.s32 6, %v8444_v10  ;;  %v4001_v0 = vrot.slane %v8473_v47, %v8447_v11 }
 0x172   :  { %1299 = vadd.xlane.f32.xlu1 %v1298_v14  ;;  %v1310_v25 = vsel %vm146_vm0, %v1288_v22, 0.0 }
 0x174   :  { %1302 = vadd.xlane.f32.xlu0 %v1301_v19 }
 0x176   :  { %1305 = vadd.xlane.f32.xlu1 %v1304_v21  ;;  %v8561_v21 = vsub.s32 5, %v8444_v10 }
 0x178   :  { %1308 = vadd.xlane.f32.xlu0 %v1307_v24 }
 0x17a   :  { %1311 = vadd.xlane.f32.xlu1 %v1310_v25 }
 0x1f9   :  { %v1291_v23 = vpop.xlane.xlu0 %1290 }
 0x1fa   :  { %v1326_v31 = vrot.slane %v1291_v23, %v8529_v27 }
 0x1fb   :  { %v1297_v29 = vpop.xlane.xlu1 %1296 }
 0x1fc   :  { %v1334_v33 = vrot.slane %v1297_v29, %v8529_v27 }
 0x1fd   :  { %v1294_v30 = vpop.xlane.xlu0 %1293 }
 0x1fe   :  { %v1330_v32 = vrot.slane %v1294_v30, %v8529_v27 }
 0x1ff   :  { %v1300_v37 = vpop.xlane.xlu1 %1299 }
 0x200   :  { %v1356_v38 = vsel %vm1355_vm1, %v1330_v32, %v1326_v31  ;;  %v1338_v9 = vrot.slane %v1300_v37, %v8529_v27 }
 0x201   :  { %v1358_v39 = vsel %vm1357_vm2, %v1334_v33, %v1356_v38  ;;  %v1303_v40 = vpop.xlane.xlu0 %1302 }
 0x202   :  { %v1360_v41 = vsel %vm1359_vm3, %v1338_v9, %v1358_v39  ;;  %v1342_v42 = vrot.slane %v1303_v40, %v8529_v27 }
 0x203   :  { %v1306_v46 = vpop.xlane.xlu1 %1305 }
 0x204   :  { %v1362_v48 = vsel %vm1361_vm4, %v1342_v42, %v1360_v41  ;;  %v1346_v49 = vrot.slane %v1306_v46, %v8529_v27 }
 0x205   :  { %v1309_v50 = vpop.xlane.xlu0 %1308 }
 0x206   :  { %v1350_v51 = vrot.slane %v1309_v50, %v8529_v27  ;;  %v1364_v53 = vsel %vm1363_vm5, %v1346_v49, %v1362_v48 }
 0x207   :  { %v1312_v54 = vpop.xlane.xlu1 %1311 }
 0x208   :  { %v1354_v55 = vrot.slane %v1312_v54, %v8529_v27  ;;  %v1366_v56 = vsel %vm1365_vm6, %v1350_v51, %v1364_v53 }
 0x20a   :  { %v1368_v57 = vsel %vm1367_vm7, %v1354_v55, %v1366_v56  ;;  %v103_v55 = vld [vmem:[#allocation5] sm:$0xff] }
 0x20b   :  { %v1371_v59 = vsel %vm1370_vm8, %v1368_v57, -inf  ;;  %v1575_v56 = vrot.slane %v103_v55, %v8447_v11  ;;  %v1582_v57 = vrot.slane %v103_v55, %v8450_v13  ;;  %v1596_v60 = vrot.slane %v103_v55, %v8551_v63 }
 0x20c   :  { %1372 = vmax.xlane.f32.xlu0 %v1371_v59  ;;  %v1589_v59 = vrot.slane %v103_v55, %v8548_v62 }
 0x299   :  { %v1373_v1 = vpop.xlane.xlu0 %1372 }
 0x29a   :  { %v1378_v2 = vrot.slane %v1373_v1, %v8447_v11  ;;  %v1382_v4 = vrot.slane %v1373_v1, %v8450_v13  ;;  %v1386_v5 = vrot.slane %v1373_v1, %v8548_v62  ;;  %v1390_v12 = vrot.slane %v1373_v1, %v8551_v63 }
 0x29b   :  { %v1394_v22 = vrot.slane %v1373_v1, %v8557_v6  ;;  %v1398_v31 = vrot.slane %v1373_v1, %v8561_v21 }
 0x29c   :  { %v1415_v14 = vsub.f32 %v1291_v23, %v1378_v2  ;;  %v1416_v15 = vsub.f32 %v1294_v30, %v1382_v4  ;;  %v1417_v16 = vsub.f32 %v1297_v29, %v1386_v5  ;;  %v1418_v24 = vsub.f32 %v1300_v37, %v1390_v12 }
 0x29d   :  { %v1419_v32 = vsub.f32 %v1303_v40, %v1394_v22  ;;  %v8569_v29 = vsub.s32 7, %v8444_v10  ;;  %v1402_v30 = vrot.slane %v1373_v1, %v8565_v26  ;;  %v1420_v33 = vsub.f32 %v1306_v46, %v1398_v31 }
 0x29e   :  { %v1423_v19 = vmul.f32 1.442695, %v1415_v14  ;;  %v1425_v20 = vmul.f32 1.442695, %v1416_v15  ;;  %v1427_v25 = vmul.f32 1.442695, %v1417_v16  ;;  %v1610_v2 = vrot.slane %v103_v55, %v8561_v21 }
 0x29f   :  { %v1429_v23 = vmul.f32 1.442695, %v1418_v24  ;;  %v1431_v38 = vmul.f32 1.442695, %v1419_v32  ;;  %v1406_v39 = vrot.slane %v1373_v1, %v8569_v29  ;;  %v1421_v41 = vsub.f32 %v1309_v50, %v1402_v30 }
 0x2a0   :  { %7976 = vpow2.f32 %v1423_v19  ;;  %v1433_v40 = vmul.f32 1.442695, %v1420_v33  ;;  %v1603_v1 = vrot.slane %v103_v55, %v8557_v6  ;;  %v1617_v4 = vrot.slane %v103_v55, %v8565_v26 }
 0x2a1   :  { %7978 = vpow2.f32 %v1425_v20  ;;  %v1422_v42 = vsub.f32 %v1312_v54, %v1406_v39  ;;  %v1435_v46 = vmul.f32 1.442695, %v1421_v41  ;;  %v1624_v5 = vrot.slane %v103_v55, %v8569_v29 }
 0x2a2   :  { %7980 = vpow2.f32 %v1427_v25 }
 0x2a3   :  { %7982 = vpow2.f32 %v1429_v23  ;;  %v1437_v49 = vmul.f32 1.442695, %v1422_v42 }
 0x2a4   :  { %7984 = vpow2.f32 %v1431_v38 }
 0x2a5   :  { %7986 = vpow2.f32 %v1433_v40 }
 0x2a6   :  { %7988 = vpow2.f32 %v1435_v46 }
 0x2a7   :  { %7990 = vpow2.f32 %v1437_v49 }
 0x2aa   :  { %v8572_v37 = vpop.eup %7976 }
 0x2ab   :  { %v8574_v9 = vpop.eup %7978  ;;  %1448 = vperm.xlu1 %7968, %v8572_v37  }
 0x2ac   :  { %1451 = vperm.xlu0 %7969, %v8574_v9   ;;  %v8579_v10 = vpop.eup %7980 }
 0x2ad   :  { %v8582_v48 = vpop.eup %7982 }
 0x2ae   :  { %v8585_v51 = vpop.eup %7984 }
 0x2af   :  { %1454 = vperm.xlu1 %7968, %v8579_v10   ;;  %v8588_v50 = vpop.eup %7986 }
 0x2b0   :  { %v8591_v53 = vpop.eup %7988  ;;  %1577 = vbcast.lane.b32.xlu0 %v1575_v56, 256 }
 0x2b1   :  { %v8594_v54 = vpop.eup %7990 }
 0x2b3   :  { %1457 = vperm.xlu1 %7968, %v8582_v48  }
 0x2b4   :  { %1584 = vbcast.lane.b32.xlu0 %v1582_v57, 256 }
 0x2b7   :  { %1460 = vperm.xlu1 %7968, %v8585_v51  }
 0x2b8   :  { %1591 = vbcast.lane.b32.xlu0 %v1589_v59, 256 }
 0x2bb   :  { %1463 = vperm.xlu1 %7968, %v8588_v50  }
 0x2bc   :  { %1598 = vbcast.lane.b32.xlu0 %v1596_v60, 256 }
 0x2bf   :  { %1466 = vperm.xlu1 %7968, %v8591_v53  }
 0x2c0   :  { %1605 = vbcast.lane.b32.xlu0 %v1603_v1, 256 }
 0x2c3   :  { %1469 = vperm.xlu1 %7968, %v8594_v54  }
 0x2c4   :  { %1612 = vbcast.lane.b32.xlu0 %v1610_v2, 256 }
 0x2c8   :  { %1619 = vbcast.lane.b32.xlu0 %v1617_v4, 256 }
 0x2cc   :  { %1626 = vbcast.lane.b32.xlu0 %v1624_v5, 256 }
 0x32a   :  { %v1449_v12 = vpop.permute.xlu1 %1448 }
 0x32b   :  { %v1452_v19 = vpop.permute.xlu0 %1451  ;;  %v1474_v24 = vrot.slane %v1449_v12, %v8529_v27 }
 0x32c   :  { %v1478_v22 = vrot.slane %v1452_v19, %v8529_v27 }
 0x32e   :  { %v1455_v14 = vpop.permute.xlu1 %1454  ;;  %v1503_v30 = vsel %vm1355_vm1, %v1478_v22, %v1474_v24 }
 0x32f   :  { %v1482_v25 = vrot.slane %v1455_v14, %v8529_v27  ;;  %v8621_v59 = vpop.permute.xlu0 %1577 }
 0x331   :  { %v1504_v38 = vsel %vm1357_vm2, %v1482_v25, %v1503_v30 }
 0x332   :  { %v1458_v15 = vpop.permute.xlu1 %1457 }
 0x333   :  { %v1486_v31 = vrot.slane %v1458_v15, %v8529_v27  ;;  %v8623_v60 = vpop.permute.xlu0 %1584 }
 0x335   :  { %v1505_v41 = vsel %vm1359_vm3, %v1486_v31, %v1504_v38 }
 0x336   :  { %v1461_v16 = vpop.permute.xlu1 %1460 }
 0x337   :  { %v1490_v32 = vrot.slane %v1461_v16, %v8529_v27  ;;  %v8625_v1 = vpop.permute.xlu0 %1591 }
 0x339   :  { %v1506_v40 = vsel %vm1361_vm4, %v1490_v32, %v1505_v41 }
 0x33a   :  { %v1464_v20 = vpop.permute.xlu1 %1463 }
 0x33b   :  { %v1494_v33 = vrot.slane %v1464_v20, %v8529_v27  ;;  %v8627_v4 = vpop.permute.xlu0 %1598 }
 0x33d   :  { %v1507_v46 = vsel %vm1363_vm5, %v1494_v33, %v1506_v40 }
 0x33e   :  { %v1467_v23 = vpop.permute.xlu1 %1466 }
 0x33f   :  { %v1498_v39 = vrot.slane %v1467_v23, %v8529_v27  ;;  %v8634_v19 = vpop.permute.xlu0 %1605 }
 0x341   :  { %v1508_v55 = vsel %vm1365_vm6, %v1498_v39, %v1507_v46 }
 0x342   :  { %v1470_v42 = vpop.permute.xlu1 %1469 }
 0x343   :  { %v1502_v49 = vrot.slane %v1470_v42, %v8529_v27  ;;  %v8638_v24 = vpop.permute.xlu0 %1612 }
 0x345   :  { %v1509_v56 = vsel %vm1367_vm7, %v1502_v49, %v1508_v55 }
 0x346   :  { %v1511_v57 = vsel %vm1370_vm8, %v1509_v56, 0.0 }
 0x347   :  { %1512 = vadd.xlane.f32.xlu1 %v1511_v57  ;;  %v8643_v39 = vpop.permute.xlu0 %1619 }
 0x348   :  { %9719 = vst [vmem:[#allocation15_spill] sm:$0xff] %v8643_v39 }
 0x3d4   :  { %v1513_v2 = vpop.xlane.xlu1 %1512 }
 0x3d5   :  { %v1538_v5 = vrot.slane %v1513_v2, %v8561_v21  ;;  %v1522_v12 = vrot.slane %v1513_v2, %v8450_v13  ;;  %v1518_v14 = vrot.slane %v1513_v2, %v8447_v11  ;;  %v1526_v15 = vrot.slane %v1513_v2, %v8548_v62 }
 0x3d6   :  { %v1530_v16 = vrot.slane %v1513_v2, %v8551_v63  ;;  %v1546_v20 = vrot.slane %v1513_v2, %v8569_v29  ;;  %v1534_v22 = vrot.slane %v1513_v2, %v8557_v6  ;;  %v1542_v25 = vrot.slane %v1513_v2, %v8565_v26 }
 0x3d7   :  { %7992 = vrcp.f32 %v1538_v5 }
 0x3d8   :  { %7994 = vrcp.f32 %v1522_v12 }
 0x3d9   :  { %7996 = vrcp.f32 %v1518_v14 }
 0x3da   :  { %7998 = vrcp.f32 %v1526_v15 }
 0x3db   :  { %8000 = vrcp.f32 %v1530_v16 }
 0x3dc   :  { %8002 = vrcp.f32 %v1546_v20 }
 0x3dd   :  { %8004 = vrcp.f32 %v1534_v22 }
 0x3de   :  { %8006 = vrcp.f32 %v1542_v25 }
 0x3e1   :  { %v7993_v31 = vpop.eup %7992 }
 0x3e2   :  { %v7995_v32 = vpop.eup %7994  ;;  %v1566_v46 = vmul.f32 %v7993_v31, %v8588_v50  ;;  %v8663_v50 = vpop.permute.xlu0 %1626 }
 0x3e3   :  { %v7997_v23 = vpop.eup %7996  ;;  %v1558_v30 = vmul.f32 %v7995_v32, %v8574_v9  ;;  %9720 = vst [vmem:[#allocation16_spill] sm:$0xff] %v8663_v50 }
 0x3e4   :  { %v7999_v33 = vpop.eup %7998  ;;  %v1556_v38 = vmul.f32 %v7997_v23, %v8572_v37  ;;  %v8660_v57 = vmul.f32 %v8638_v24, %v1566_v46 }
 0x3e5   :  { %v8646_v41 = vmul.f32 %v8623_v60, %v1558_v30  ;;  %v1560_v40 = vmul.f32 %v7999_v33, %v8579_v10  ;;  %v8001_v42 = vpop.eup %8000 }
 0x3e6   :  { %v8651_v49 = vmul.f32 %v8621_v59, %v1556_v38  ;;  %v8003_v55 = vpop.eup %8002  ;;  %v1562_v9 = vmul.f32 %v8001_v42, %v8582_v48 }
 0x3e7   :  { %1656 = vperm.xlu0 %7969, %v8646_v41   ;;  %v8656_v37 = vmul.f32 %v8625_v1, %v1560_v40  ;;  %v8005_v56 = vpop.eup %8004  ;;  %v1570_v10 = vmul.f32 %v8003_v55, %v8594_v54 }
 0x3e8   :  { %1653 = vperm.xlu1 %7968, %v8651_v49   ;;  %v1564_v2 = vmul.f32 %v8005_v56, %v8585_v51  ;;  %v8669_v5 = vmul.f32 %v8627_v4, %v1562_v9  ;;  %v8007_v12 = vpop.eup %8006 }
 0x3e9   :  { %v8672_v48 = vmul.f32 %v8663_v50, %v1570_v10  ;;  %v1568_v14 = vmul.f32 %v8007_v12, %v8591_v53  ;;  %v3990_v12 = vcombine.high %v8460_v35, %v8460_v35 }
 0x3ea   :  { %v8677_v54 = vmul.f32 %v8634_v19, %v1564_v2  ;;  %v3997_v2 = vrot.slane %v8460_v35, %v8447_v11 }
 0x3eb   :  { %1659 = vperm.xlu0 %7969, %v8656_v37   ;;  %v8682_v51 = vmul.f32 %v8643_v39, %v1568_v14 }
 0x3ec   :  { %1668 = vperm.xlu1 %7968, %v8660_v57  }
 0x3ef   :  { %1662 = vperm.xlu0 %7969, %v8669_v5  }
 0x3f0   :  { %1674 = vperm.xlu1 %7968, %v8672_v48  }
 0x3f3   :  { %1665 = vperm.xlu0 %7969, %v8677_v54  }
 0x3f7   :  { %1671 = vperm.xlu0 %7969, %v8682_v51  }
 0x466   :  { %v1657_v15 = vpop.permute.xlu0 %1656 }
 0x467   :  { %v1654_v16 = vpop.permute.xlu1 %1653  ;;  %v1683_v22 = vrot.slane %v1657_v15, %v8529_v27 }
 0x468   :  { %v1679_v25 = vrot.slane %v1654_v16, %v8529_v27 }
 0x46a   :  { %v1660_v20 = vpop.permute.xlu0 %1659  ;;  %v1708_v30 = vsel %vm1355_vm1, %v1683_v22, %v1679_v25  ;;  %v4034_v25 = vmul.f32 %v3997_v2, %v8458_v34  ;;  %v3993_v2 = vcombine.high %v8519_v18, %v8519_v18 }
 0x46b   :  { %v1687_v32 = vrot.slane %v1660_v20, %v8529_v27  ;;  %v1669_v23 = vpop.permute.xlu1 %1668 }
 0x46c   :  { %v1699_v9 = vrot.slane %v1669_v23, %v8529_v27  ;;  %v4042_v35 = vsel %vm146_vm0, %v4034_v25, 0.0 }
 0x46d   :  { %v1709_v38 = vsel %vm1357_vm2, %v1687_v32, %v1708_v30  ;;  %v3992_v32 = vcombine.high %v8473_v47, %v8473_v47 }
 0x46e   :  { %v1663_v31 = vpop.permute.xlu0 %1662 }
 0x46f   :  { %v1691_v53 = vrot.slane %v1663_v31, %v8529_v27  ;;  %v1675_v46 = vpop.permute.xlu1 %1674  ;;  %v4005_v31 = vrot.slane %v3990_v12, %v8447_v11 }
 0x470   :  { %v1707_v14 = vrot.slane %v1675_v46, %v8529_v27  ;;  %v4017_v46 = vrot.slane %v8519_v18, %v8447_v11 }
 0x471   :  { %v1710_v42 = vsel %vm1359_vm3, %v1691_v53, %v1709_v38  ;;  %v4036_v23 = vmul.f32 %v4005_v31, %v8466_v43  ;;  %v4009_v53 = vrot.slane %v3992_v32, %v8447_v11  ;;  %v4013_v38 = vrot.slane %v8504_v7, %v8447_v11 }
 0x472   :  { %v1666_v33 = vpop.permute.xlu0 %1665 }
 0x473   :  { %v1695_v40 = vrot.slane %v1666_v33, %v8529_v27  ;;  %v4048_v30 = vsel %vm146_vm0, %v4036_v23, 0.0  ;;  %v4037_v33 = vmul.f32 %v4009_v53, %v8481_v52 }
 0x475   :  { %v1711_v55 = vsel %vm1361_vm4, %v1695_v40, %v1710_v42  ;;  %v4051_v40 = vsel %vm146_vm0, %v4037_v33, 0.0  ;;  %v4038_v42 = vmul.f32 %v4013_v38, %v8491_v61 }
 0x476   :  { %v1672_v56 = vpop.permute.xlu0 %1671  ;;  %v1712_v15 = vsel %vm1363_vm5, %v1699_v9, %v1711_v55  ;;  %v3991_v55 = vcombine.high %v8504_v7, %v8504_v7 }
 0x477   :  { %v1703_v10 = vrot.slane %v1672_v56, %v8529_v27  ;;  %v4054_v9 = vsel %vm146_vm0, %v4038_v42, 0.0  ;;  %v4039_v56 = vmul.f32 %v4017_v46, %v8499_v3 }
 0x479   :  { %v1713_v16 = vsel %vm1365_vm6, %v1703_v10, %v1712_v15  ;;  %v4021_v10 = vrot.slane %v3991_v55, %v8447_v11  ;;  %v4057_v12 = vsel %vm146_vm0, %v4039_v56, 0.0  ;;  %v4025_v15 = vrot.slane %v3993_v2, %v8447_v11 }
 0x47a   :  { %v1714_v20 = vsel %vm1367_vm7, %v1707_v14, %v1713_v16 }
 0x47b   :  { %v1716_v22 = vsel %vm1370_vm8, %v1714_v20, 0.0  ;;  %v4040_v14 = vmul.f32 %v4021_v10, %v8509_v8  ;;  %v4041_v16 = vmul.f32 %v4025_v15, %v8517_v17 }
 0x47c   :  { %1717 = vadd.xlane.f32.xlu0 %v1716_v22 }
 0x47d   :  { %v4060_v7 = vsel %vm146_vm0, %v4040_v14, 0.0  ;;  %v4063_v20 = vsel %vm146_vm0, %v4041_v16, 0.0  ;;  %v9704_v16 = vmov 0.0|0.0  }
 0x47e   :  { %7564 = vmatprep.subr.bf16.mxu0 %v9704_v16  ;;  %7528 = vmatprep.subr.bf16.mxu1 %v9704_v16 }
 0x480   :  { %4043 = vadd.xlane.f32.xlu0 %v4042_v35 }
 0x484   :  { %4049 = vadd.xlane.f32.xlu0 %v4048_v30 }
 0x488   :  { %4052 = vadd.xlane.f32.xlu0 %v4051_v40 }
 0x48c   :  { %4055 = vadd.xlane.f32.xlu0 %v4054_v9 }
 0x490   :  { %4058 = vadd.xlane.f32.xlu0 %v4057_v12 }
 0x494   :  { %4061 = vadd.xlane.f32.xlu0 %v4060_v7 }
 0x498   :  { %4064 = vadd.xlane.f32.xlu0 %v4063_v20 }
 0x509   :  { %v1718_v22 = vpop.xlane.xlu0 %1717 }
 0x50a   :  { %v1719_v25 = vadd.f32 1e-06, %v1718_v22 }
 0x50c   :  { %v1724_v18 = vrot.slane %v1719_v25, %v8447_v11  ;;  %v1728_v31 = vrot.slane %v1719_v25, %v8450_v13  ;;  %v1732_v32 = vrot.slane %v1719_v25, %v8548_v62  ;;  %v1736_v35 = vrot.slane %v1719_v25, %v8551_v63 }
 0x50d   :  { %v1740_v53 = vrot.slane %v1719_v25, %v8557_v6  ;;  %v1744_v38 = vrot.slane %v1719_v25, %v8561_v21  ;;  %v1748_v46 = vrot.slane %v1719_v25, %v8565_v26  ;;  %v1752_v56 = vrot.slane %v1719_v25, %v8569_v29 }
 0x50e   :  { %8008 = vrcp.f32 %v1724_v18 }
 0x50f   :  { %8010 = vrcp.f32 %v1728_v31 }
 0x510   :  { %8012 = vrcp.f32 %v1732_v32 }
 0x511   :  { %8014 = vrcp.f32 %v1736_v35 }
 0x512   :  { %8016 = vrcp.f32 %v1740_v53 }
 0x513   :  { %8018 = vrcp.f32 %v1744_v38 }
 0x514   :  { %8020 = vrcp.f32 %v1748_v46 }
 0x515   :  { %8022 = vrcp.f32 %v1752_v56 }
 0x518   :  { %v8009_v23 = vpop.eup %8008 }
 0x519   :  { %v1762_v30 = vmul.f32 %v8009_v23, %v8651_v49  ;;  %v8011_v33 = vpop.eup %8010 }
 0x51a   :  { %v1764_v40 = vmul.f32 %v8011_v33, %v8646_v41  ;;  %v8013_v42 = vpop.eup %8012 }
 0x51b   :  { %1786 = vperm.xlu1 %7968, %v1762_v30   ;;  %v1766_v55 = vmul.f32 %v8013_v42, %v8656_v37  ;;  %v8015_v9 = vpop.eup %8014 }
 0x51c   :  { %v1768_v49 = vmul.f32 %v8015_v9, %v8669_v5  ;;  %v8017_v10 = vpop.eup %8016  ;;  %v1922_v5 = vld [vmem:[%s9698_s6] sm:$0xff] }
 0x51d   :  { %v1770_v2 = vmul.f32 %v8017_v10, %v8677_v54  ;;  %v8019_v41 = vpop.eup %8018  ;;  %v1923_v54 = vld [vmem:[%s9698_s6 + $0x8] sm:$0xff] }
 0x51e   :  { %v1772_v12 = vmul.f32 %v8019_v41, %v8660_v57  ;;  %v8021_v14 = vpop.eup %8020  ;;  %v1924_v57 = vld [vmem:[%s9698_s6 + $0x10] sm:$0xff]  ;;  %v1954_v20 = vand.u32 4294901760, %v1923_v54 }
 0x51f   :  { %1789 = vperm.xlu1 %7968, %v1764_v40   ;;  %v1774_v37 = vmul.f32 %v8021_v14, %v8682_v51  ;;  %v8023_v15 = vpop.eup %8022  ;;  %v1951_v51 = vand.u32 4294901760, %v1922_v5  ;;  %v1957_v22 = vand.u32 4294901760, %v1924_v57 }
 0x520   :  { %v1776_v7 = vmul.f32 %v8023_v15, %v8672_v48  ;;  %v1925_v48 = vld [vmem:[%s9698_s6 + $0x18] sm:$0xff]  ;;  %v8771_v32 = vsub.f32 %v1923_v54, %v1954_v20 }
 0x521   :  { %v1960_v25 = vand.u32 4294901760, %v1925_v48  ;;  %v8767_v18 = vpack.c.bf16 %v1954_v20, %v1951_v51  ;;  %v8769_v31 = vsub.f32 %v1922_v5, %v1951_v51  ;;  %v8773_v35 = vsub.f32 %v1924_v57, %v1957_v22 }
 0x522   :  { %v2039_v33 = vand.u32 4294901760, %v8771_v32 }
 0x523   :  { %1792 = vperm.xlu1 %7968, %v1766_v55   ;;  %v8775_v23 = vsub.f32 %v1925_v48, %v1960_v25  ;;  %7566 = vmatpush3.bf16.msra.mxu0 %v8767_v18  ;;  %v8778_v53 = vpack.c.bf16 %v1960_v25, %v1957_v22  ;;  %v2032_v30 = vand.u32 4294901760, %v8769_v31  ;;  %v2046_v42 = vand.u32 4294901760, %v8773_v35 }
 0x524   :  { %7567 = vmatprep.subr.bf16.mxu0 %v9704_v16  ;;  %v2040_v40 = vsub.f32 %v8771_v32, %v2039_v33  ;;  %v4035_v55 = vmul.f32 %v4001_v0, %v8471_v45 }
 0x525   :  { %v2033_v38 = vsub.f32 %v8769_v31, %v2032_v30  ;;  %v2053_v46 = vand.u32 4294901760, %v8775_v23 }
 0x526   :  { %v2041_v56 = vand.u32 4294901760, %v2040_v40 }
 0x527   :  { %1795 = vperm.xlu1 %7968, %v1768_v49   ;;  %7569 = vmatpush3.bf16.msra.mxu0 %v8778_v53  ;;  %v2034_v9 = vand.u32 4294901760, %v2033_v38  ;;  %v2047_v49 = vsub.f32 %v8773_v35, %v2046_v42  ;;  %v2054_v47 = vsub.f32 %v8775_v23, %v2053_v46  ;;  %v8805_v5 = vpack.c.bf16 %v2053_v46, %v2046_v42 }
 0x528   :  { %7570 = vmatprep.subr.bf16.mxu0 %v9704_v16 }
 0x529   :  { %v8794_v10 = vpack.c.bf16 %v2041_v56, %v2034_v9  ;;  %v2055_v41 = vand.u32 4294901760, %v2054_v47 }
 0x52b   :  { %1798 = vperm.xlu1 %7968, %v1770_v2   ;;  %v2048_v2 = vand.u32 4294901760, %v2047_v49 }
 0x52d   :  { %v8797_v14 = vpack.c.bf16 %v2055_v41, %v2048_v2 }
 0x52f   :  { %1801 = vperm.xlu1 %7968, %v1772_v12   ;;  %v4045_v12 = vsel %vm146_vm0, %v4035_v55, 0.0 }
 0x533   :  { %1804 = vperm.xlu1 %7968, %v1774_v37  }
 0x537   :  { %1807 = vperm.xlu1 %7968, %v1776_v7   ;;  %v8803_v7 = vpack.c.bf16 %v2039_v33, %v2032_v30 }
 0x55b   :  { %4046 = vadd.xlane.f32.xlu1 %v4045_v12 }
 0x59a   :  { %v1787_v54 = vpop.permute.xlu1 %1786 }
 0x59b   :  { %v1858_v20 = vmul.f32 %v1787_v54, %v8458_v34 }
 0x59d   :  { %v1866_v0 = vsel %vm146_vm0, %v1858_v20, 0.0  ;;  %v1812_v20 = vrot.slane %v1787_v54, %v8529_v27 }
 0x59e   :  { %v1790_v57 = vpop.permute.xlu1 %1789  ;;  %v1867_v42 = vrot.slane %v1866_v0, 4 }
 0x59f   :  { %v1859_v51 = vmul.f32 %v1790_v57, %v8471_v45 }
 0x5a1   :  { %v1873_v25 = vsel %vm146_vm0, %v1859_v51, 0.0  ;;  %v1816_v51 = vrot.slane %v1790_v57, %v8529_v27 }
 0x5a2   :  { %v1793_v48 = vpop.permute.xlu1 %1792  ;;  %v1874_v33 = vrot.slane %v1873_v25, 4 }
 0x5a3   :  { %v1860_v22 = vmul.f32 %v1793_v48, %v8466_v43  ;;  %v1868_v43 = vadd.f32 %v1867_v42, %v1866_v0  ;;  %v1841_v57 = vsel %vm1355_vm1, %v1816_v51, %v1812_v20 }
 0x5a4   :  { %v1875_v56 = vadd.f32 %v1874_v33, %v1873_v25 }
 0x5a5   :  { %v1880_v38 = vsel %vm146_vm0, %v1860_v22, 0.0  ;;  %v1869_v37 = vrot.slane %v1868_v43, 2 }
 0x5a6   :  { %v1796_v40 = vpop.permute.xlu1 %1795  ;;  %v1881_v46 = vrot.slane %v1880_v38, 4  ;;  %v1876_v22 = vrot.slane %v1875_v56, 2 }
 0x5a7   :  { %v1861_v30 = vmul.f32 %v1796_v40, %v8481_v52  ;;  %v1824_v25 = vrot.slane %v1796_v40, %v8529_v27 }
 0x5a8   :  { %v1882_v49 = vadd.f32 %v1881_v46, %v1880_v38 }
 0x5a9   :  { %v1887_v55 = vsel %vm146_vm0, %v1861_v30, 0.0  ;;  %v1820_v30 = vrot.slane %v1793_v48, %v8529_v27  ;;  %v1877_v48 = vadd.f32 %v1876_v22, %v1875_v56 }
 0x5aa   :  { %v1888_v45 = vrot.slane %v1887_v55, 4  ;;  %v1799_v9 = vpop.permute.xlu1 %1798 }
 0x5ab   :  { %v1862_v34 = vmul.f32 %v1799_v9, %v8491_v61  ;;  %v1883_v61 = vrot.slane %v1882_v49, 2  ;;  %v1828_v33 = vrot.slane %v1799_v9, %v8529_v27 }
 0x5ac   :  { %v1889_v2 = vadd.f32 %v1888_v45, %v1887_v55  ;;  %v1842_v45 = vsel %vm1357_vm2, %v1820_v30, %v1841_v57  ;;  %v1878_v30 = vrot.slane %v1877_v48, 1 }
 0x5ad   :  { %v1894_v47 = vsel %vm146_vm0, %v1862_v34, 0.0 }
 0x5ae   :  { %v1895_v41 = vrot.slane %v1894_v47, 4  ;;  %v1802_v12 = vpop.permute.xlu1 %1801  ;;  %v1890_v38 = vrot.slane %v1889_v2, 2 }
 0x5af   :  { %v1863_v52 = vmul.f32 %v1802_v12, %v8499_v3  ;;  %v1832_v54 = vrot.slane %v1802_v12, %v8529_v27 }
 0x5b0   :  { %v1896_v15 = vadd.f32 %v1895_v41, %v1894_v47  ;;  %v1870_v47 = vadd.f32 %v1869_v37, %v1868_v43  ;;  %v1884_v41 = vadd.f32 %v1883_v61, %v1882_v49  ;;  %v1891_v16 = vadd.f32 %v1890_v38, %v1889_v2 }
 0x5b1   :  { %v1901_v0 = vsel %vm146_vm0, %v1863_v52, 0.0  ;;  %v1843_v52 = vsel %vm1359_vm3, %v1824_v25, %v1842_v45 }
 0x5b2   :  { %v1902_v42 = vrot.slane %v1901_v0, 4  ;;  %v1805_v46 = vpop.permute.xlu1 %1804  ;;  %v1897_v3 = vrot.slane %v1896_v15, 2  ;;  %v1844_v51 = vsel %vm1361_vm4, %v1828_v33, %v1843_v52  ;;  %v1885_v61 = vrot.slane %v1884_v41, 1 }
 0x5b3   :  { %v1864_v55 = vmul.f32 %v1805_v46, %v8509_v8  ;;  %v1836_v40 = vrot.slane %v1805_v46, %v8529_v27  ;;  %v1845_v8 = vsel %vm1363_vm5, %v1832_v54, %v1844_v51  ;;  %v1892_v38 = vrot.slane %v1891_v16, 1 }
 0x5b4   :  { %v1903_v34 = vadd.f32 %v1902_v42, %v1901_v0  ;;  %v1898_v39 = vadd.f32 %v1897_v3, %v1896_v15  ;;  %v1871_v0 = vrot.slane %v1870_v47, 1  ;;  %v1879_v46 = vadd.f32 %v1878_v30, %v1877_v48  ;;  %v8847_v30 = vpop.xlane.xlu0 %4043 }
 0x5b5   :  { %v1908_v9 = vsel %vm146_vm0, %v1864_v55, 0.0  ;;  %v1846_v43 = vsel %vm1365_vm6, %v1836_v40, %v1845_v8  ;;  %v1886_v54 = vadd.f32 %v1885_v61, %v1884_v41  ;;  %v1893_v45 = vadd.f32 %v1892_v38, %v1891_v16 }
 0x5b6   :  { %v1904_v20 = vrot.slane %v1903_v34, 2  ;;  %v1909_v50 = vrot.slane %v1908_v9, 4  ;;  %v1808_v12 = vpop.permute.xlu1 %1807  ;;  %v1899_v42 = vrot.slane %v1898_v39, 1  ;;  %v1872_v55 = vadd.f32 %v1871_v0, %v1870_v47  ;;  %v8852_v0 = vld [vmem:[#allocation10] sm:$0xff] }
 0x5b7   :  { %v1840_v56 = vrot.slane %v1808_v12, %v8529_v27  ;;  %v1865_v22 = vmul.f32 %v1808_v12, %v8517_v17 }
 0x5b8   :  { %v1905_v37 = vadd.f32 %v1904_v20, %v1903_v34  ;;  %v1910_v49 = vadd.f32 %v1909_v50, %v1908_v9  ;;  %v1900_v40 = vadd.f32 %v1899_v42, %v1898_v39  ;;  %v1941_v52 = vsel %vm1355_vm1, %v1879_v46, %v1872_v55  ;;  %v8849_v61 = vpop.xlane.xlu0 %4049 }
 0x5b9   :  { %v1847_v2 = vsel %vm1367_vm7, %v1840_v56, %v1846_v43  ;;  %v1915_v25 = vsel %vm146_vm0, %v1865_v22, 0.0  ;;  %v1942_v20 = vsel %vm1357_vm2, %v1886_v54, %v1941_v52  ;;  %v9722_v42 = vpack.c.bf16 %v8771_v32, %v8769_v31 }
 0x5ba   :  { %v1911_v33 = vrot.slane %v1910_v49, 2  ;;  %1849 = vst.msk [vmem:[#allocation10 + $0x18] sm:$0xff] %vm1370_vm8, %v1847_v2  ;;  %v1916_v15 = vrot.slane %v1915_v25, 4  ;;  %v1906_v57 = vrot.slane %v1905_v37, 1  ;;  %v1943_v8 = vsel %vm1359_vm3, %v1893_v45, %v1942_v20 }
 0x5bb   :  { %v1944_v48 = vsel %vm1361_vm4, %v1900_v40, %v1943_v8 }
 0x5bc   :  { %v1912_v17 = vadd.f32 %v1911_v33, %v1910_v49  ;;  %v1917_v3 = vadd.f32 %v1916_v15, %v1915_v25  ;;  %v1907_v9 = vadd.f32 %v1906_v57, %v1905_v37  ;;  %v8856_v38 = vpop.xlane.xlu0 %4052  ;;  %v9721_v33 = vmov 0.0|0.0  }
 0x5bd   :  { %v4089_v57 = vrot.slane %v8856_v38, %v8529_v27 }
 0x5be   :  { %v1913_v50 = vrot.slane %v1912_v17, 1  ;;  %v1918_v34 = vrot.slane %v1917_v3, 2  ;;  %v1945_v22 = vsel %vm1363_vm5, %v1907_v9, %v1944_v48 }
 0x5c0   :  { %v1919_v51 = vadd.f32 %v1918_v34, %v1917_v3  ;;  %v1914_v12 = vadd.f32 %v1913_v50, %v1912_v17  ;;  %v8861_v15 = vpop.xlane.xlu0 %4055 }
 0x5c1   :  { %v4093_v3 = vrot.slane %v8861_v15, %v8529_v27 }
 0x5c2   :  { %v1920_v56 = vrot.slane %v1919_v51, 1  ;;  %v1946_v16 = vsel %vm1365_vm6, %v1914_v12, %v1945_v22  ;;  %v125_v12 = vld [vmem:[%s9696_s4 + $0x40] sm:$0xff] }
 0x5c3   :  { %v700_v48 = vand.u32 4294901760, %v125_v12 }
 0x5c4   :  { %v1921_v41 = vadd.f32 %v1920_v56, %v1919_v51  ;;  %v8872_v46 = vpop.xlane.xlu0 %4058  ;;  %v128_v56 = vld [vmem:[%s9696_s4 + $0x58] sm:$0xff] }
 0x5c5   :  { %v4097_v45 = vrot.slane %v8872_v46, %v8529_v27  ;;  %v703_v22 = vand.u32 4294901760, %v128_v56 }
 0x5c6   :  { %v1947_v47 = vsel %vm1367_vm7, %v1921_v41, %v1946_v16 }
 0x5c7   :  { %v1948_v39 = vsel %vm146_vm0, %v1947_v47, 0 }
 0x5c8   :  { %v2019_v37 = vand.u32 4294901760, %v1948_v39  ;;  %v8879_v31 = vpop.xlane.xlu0 %4061 }
 0x5ca   :  { %v2020_v43 = vsub.f32 %v1948_v39, %v2019_v37  ;;  %v788_v39 = vsub.f32 %v125_v12, %v700_v48 }
 0x5cc   :  { %v2021_v49 = vand.u32 4294901760, %v2020_v43  ;;  %v8899_v54 = vpop.xlane.xlu0 %4064 }
 0x5cd   :  { %v4105_v40 = vrot.slane %v8899_v54, %v8529_v27 }
 0x5ce   :  { %v2022_v2 = vsub.f32 %v2020_v43, %v2021_v49 }
 0x5d0   :  { %v2023_v25 = vand.u32 4294901760, %v2022_v2 }
 0x5d2   :  { %6961 = vmatmul.mubr.f32.vlgmr.msra.gmra.mrb[2].mxu0 %v2023_v25  ;;  %v789_v25 = vand.u32 4294901760, %v788_v39 }
 0x5d3   :  { %7572 = vmatpush3.bf16.msra.mxu0 %v8794_v10  ;;  %6971 = vmatprep.mubr.msk.f32.mxu0 %vm8225_vm9, %v8852_v0  ;;  %v9723_v10 = vpack.c.bf16 %v8775_v23, %v8773_v35  ;;  %v4077_v35 = vrot.slane %v8847_v30, %v8529_v27 }
 0x5d4   :  { %7573 = vmatprep.subr.bf16.mxu0 %v9721_v33 }
 0x5d7   :  { %7575 = vmatpush3.bf16.msra.mxu0 %v8797_v14  ;;  %v4085_v14 = vrot.slane %v8849_v61, %v8529_v27 }
 0x5d8   :  { %7576 = vmatprep.subr.bf16.mxu0 %v9721_v33 }
 0x5da   :  { %6972 = vmatmul.mubr.f32.vlgmr.msra.gmra.mrb[2].mxu0 %v2019_v37 }
 0x5db   :  { %7578 = vmatpush3.bf16.msra.mxu0 %v9722_v42  ;;  %6982 = vmatprep.mubr.msk.f32.mxu0 %vm8225_vm9, %v8852_v0 }
 0x5dc   :  { %7579 = vmatprep.subr.bf16.mxu0 %v9721_v33 }
 0x5df   :  { %7581 = vmatpush3.bf16.msra.mxu0 %v9723_v10 }
 0x5e0   :  { %7582 = vmatprep.subr.bf16.mxu0 %v9721_v33 }
 0x5e2   :  { %6983 = vmatmul.mubr.f32.vlgmr.msra.gmra.mrb[2].mxu0 %v2020_v43  ;;  %v7532_v43 = vpack.c.bf16 %v703_v22, %v700_v48  ;;  %v107_v48 = vld [vmem:[%s9700_s8 + $0x10] sm:$0xff] }
 0x5e3   :  { %7584 = vmatpush3.bf16.msra.mxu0 %v8767_v18  ;;  %6993 = vmatprep.mubr.msk.f32.mxu0 %vm8225_vm9, %v8852_v0 }
 0x5e4   :  { %7585 = vmatprep.subr.bf16.mxu0 %v9721_v33 }
 0x5e7   :  { %7587 = vmatpush3.bf16.msra.mxu0 %v8778_v53 }
 0x5e8   :  { %v8882_v32 = vpop.xlane.xlu1 %4046  ;;  %7588 = vmatprep.subr.bf16.mxu0 %v9721_v33 }
 0x5e9   :  { %v4081_v23 = vrot.slane %v8882_v32, %v8529_v27 }
 0x5ea   :  { %6994 = vmatmul.mubr.f32.vlgmr.msra.gmra.mrb[2].mxu0 %v2021_v49 }
 0x5eb   :  { %v4106_v17 = vsel %vm1355_vm1, %v4081_v23, %v4077_v35  ;;  %7590 = vmatpush3.bf16.msra.mxu0 %v8803_v7  ;;  %7004 = vmatprep.mubr.msk.f32.mxu0 %vm8225_vm9, %v8852_v0  ;;  %v4101_v7 = vrot.slane %v8879_v31, %v8529_v27  ;;  %v790_v23 = vsub.f32 %v788_v39, %v789_v25 }
 0x5ec   :  { %v4107_v55 = vsel %vm1357_vm2, %v4085_v14, %v4106_v17  ;;  %7591 = vmatprep.subr.bf16.mxu0 %v9721_v33 }
 0x5ed   :  { %v4108_v50 = vsel %vm1359_vm3, %v4089_v57, %v4107_v55 }
 0x5ee   :  { %v4109_v34 = vsel %vm1361_vm4, %v4093_v3, %v4108_v50  ;;  %v791_v3 = vand.u32 4294901760, %v790_v23 }
 0x5ef   :  { %7593 = vmatpush3.bf16.msra.mxu0 %v8805_v5  ;;  %v4110_v52 = vsel %vm1363_vm5, %v4097_v45, %v4109_v34  ;;  %v119_v5 = vld [vmem:[%s9696_s4 + $0x10] sm:$0xff] }
 0x5f0   :  { %7594 = vmatprep.subr.bf16.mxu0 %v9721_v33  ;;  %v4111_v9 = vsel %vm1365_vm6, %v4101_v7, %v4110_v52  ;;  %v694_v8 = vand.u32 4294901760, %v119_v5  ;;  %v109_v52 = vld [vmem:[%s9701_s9] sm:$0xff] }
 0x5f1   :  { %v4112_v51 = vsel %vm1367_vm7, %v4105_v40, %v4111_v9 }
 0x5f2   :  { %7005 = vmatmul.mubr.f32.vlgmr.msra.gmra.mrb[2].mxu0 %v2019_v37  ;;  %v4114_v20 = vsel %vm1370_vm8, %v4112_v51, -inf  ;;  %v774_v16 = vsub.f32 %v119_v5, %v694_v8 }
 0x5f3   :  { %7596 = vmatpush3.bf16.msra.mxu0 %v8767_v18  ;;  %4115 = vmax.xlane.f32.xlu0 %v4114_v20  ;;  %v122_v18 = vld [vmem:[%s9696_s4 + $0x28] sm:$0xff]  ;;  %v2947_v20 = vsel %vm1370_vm8, %v109_v52, 0 }
 0x5f4   :  { %7597 = vmatprep.subr.bf16.mxu0 %v9721_v33  ;;  %7015 = vmatprep.mubr.msk.f32.mxu0 %vm8225_vm9, %v8852_v0  ;;  %v775_v49 = vand.u32 4294901760, %v774_v16 }
 0x5f6   :  { %v776_v10 = vsub.f32 %v774_v16, %v775_v49 }
 0x5f7   :  { %7599 = vmatpush3.bf16.msra.mxu0 %v8778_v53  ;;  %v697_v53 = vand.u32 4294901760, %v122_v18 }
 0x5f8   :  { %7636 = vmatprep.subr.bf16.mxu0 %v9721_v33  ;;  %v777_v57 = vand.u32 4294901760, %v776_v10 }
 0x5f9   :  { %v7529_v41 = vpack.c.bf16 %v697_v53, %v694_v8  ;;  %v781_v47 = vsub.f32 %v122_v18, %v697_v53  ;;  %v2959_v8 = vand.u32 4294901760, %v2947_v20 }
 0x5fa   :  { %7016 = vmatmul.mubr.f32.vlgmr.msra.gmra.mrb[2].mxu0 %v2019_v37  ;;  %v795_v37 = vsub.f32 %v128_v56, %v703_v22  ;;  %v108_v22 = vld [vmem:[%s9700_s8 + $0x18] sm:$0xff] }
 0x5fb   :  { %7092 = vmatprep.mubr.msk.f32.mxu0 %vm8225_vm9, %v8852_v0  ;;  %7530 = vmatpush3.bf16.msra.mxu1 %v7529_v41  ;;  %v782_v2 = vand.u32 4294901760, %v781_v47  ;;  %v7541_v7 = vpack.c.bf16 %v781_v47, %v774_v16 }
 0x5fc   :  { %7531 = vmatprep.subr.bf16.mxu1 %v9721_v33  ;;  %v796_v42 = vand.u32 4294901760, %v795_v37  ;;  %v7544_v34 = vpack.c.bf16 %v795_v37, %v788_v39 }
 0x5fd   :  { %v783_v35 = vsub.f32 %v781_v47, %v782_v2 }
 0x5fe   :  { %v797_v14 = vsub.f32 %v795_v37, %v796_v42  ;;  %v7556_v40 = vpack.c.bf16 %v796_v42, %v789_v25  ;;  %v2453_v37 = vsel %vm2442_vm10, %v107_v48, 0  ;;  %v104_v25 = vld [vmem:[#allocation7] sm:$0xff] }
 0x5ff   :  { %7533 = vmatpush3.bf16.msra.mxu1 %v7532_v43  ;;  %v784_v17 = vand.u32 4294901760, %v783_v35  ;;  %v2465_v42 = vand.u32 4294901760, %v2453_v37 }
 0x600   :  { %7534 = vmatprep.subr.bf16.mxu1 %v9721_v33  ;;  %v798_v55 = vand.u32 4294901760, %v797_v14 }
 0x601   :  { %v7535_v45 = vpack.c.bf16 %v784_v17, %v777_v57  ;;  %v2444_v57 = vsel %vm2442_vm10, %v104_v25, 0 }
 0x602   :  { %6895 = vmatmul.mubr.f32.vlgmr.msra.gmra.mrb[0].mxu1 %v8416_v58  ;;  %v7538_v50 = vpack.c.bf16 %v798_v55, %v791_v3  ;;  %v7553_v58 = vpack.c.bf16 %v782_v2, %v775_v49  ;;  %v112_v49 = vld [vmem:[%s9701_s9 + $0x18] sm:$0xff]  ;;  %v9014_v55 = vand.u32 4294901760, %v2444_v57 }
 0x603   :  { %7536 = vmatpush3.bf16.msra.mxu1 %v7535_v45  ;;  %6905 = vmatprep.mubr.msk.f32.mxu1 %vm8225_vm9, %v8852_v0  ;;  %v2956_v35 = vsel %vm1370_vm8, %v112_v49, 0 }
 0x604   :  { %7537 = vmatprep.subr.bf16.mxu1 %v9721_v33  ;;  %v2968_v14 = vand.u32 4294901760, %v2956_v35 }
 0x607   :  { %7539 = vmatpush3.bf16.msra.mxu1 %v7538_v50 }
 0x608   :  { %7540 = vmatprep.subr.bf16.mxu1 %v9721_v33 }
 0x60a   :  { %6906 = vmatmul.mubr.f32.vlgmr.msra.gmra.mrb[0].mxu1 %v8390_v28 }
 0x60b   :  { %7542 = vmatpush3.bf16.msra.mxu1 %v7541_v7  ;;  %6916 = vmatprep.mubr.msk.f32.mxu1 %vm8225_vm9, %v8852_v0  ;;  %v9022_v7 = vsub.f32 %v2444_v57, %v9014_v55 }
 0x60c   :  { %7543 = vmatprep.subr.bf16.mxu1 %v9721_v33 }
 0x60f   :  { %7545 = vmatpush3.bf16.msra.mxu1 %v7544_v34 }
 0x610   :  { %7546 = vmatprep.subr.bf16.mxu1 %v9721_v33 }
 0x612   :  { %6917 = vmatmul.mubr.f32.vlgmr.msra.gmra.mrb[0].mxu1 %v8400_v36  ;;  %v105_v36 = vld [vmem:[%s9700_s8] sm:$0xff] }
 0x613   :  { %7548 = vmatpush3.bf16.msra.mxu1 %v7529_v41  ;;  %6927 = vmatprep.mubr.msk.f32.mxu1 %vm8225_vm9, %v8852_v0  ;;  %v2447_v9 = vsel %vm2442_vm10, %v105_v36, 0  ;;  %v9030_v36 = vsub.f32 %v2947_v20, %v2959_v8 }
 0x614   :  { %7549 = vmatprep.subr.bf16.mxu1 %v9721_v33  ;;  %v2459_v5 = vand.u32 4294901760, %v2447_v9 }
 0x616   :  { %v8994_v16 = vsub.f32 %v2447_v9, %v2459_v5 }
 0x617   :  { %7551 = vmatpush3.bf16.msra.mxu1 %v7532_v43 }
 0x618   :  { %7552 = vmatprep.subr.bf16.mxu1 %v9721_v33  ;;  %v9712_v17 = vand.u32 4294901760, %v8994_v16 }
 0x61a   :  { %6928 = vmatmul.mubr.f32.vlgmr.msra.gmra.mrb[0].mxu1 %v8410_v44  ;;  %v106_v44 = vld [vmem:[%s9700_s8 + $0x8] sm:$0xff]  ;;  %v2541_v45 = vsub.f32 %v8994_v16, %v9712_v17 }
 0x61b   :  { %6938 = vmatprep.mubr.msk.f32.mxu1 %vm8225_vm9, %v8852_v0  ;;  %7554 = vmatpush3.bf16.msra.mxu1 %v7553_v58  ;;  %v2450_v51 = vsel %vm2442_vm10, %v106_v44, 0 }
 0x61c   :  { %7555 = vmatprep.subr.bf16.mxu1 %v9721_v33  ;;  %v2462_v18 = vand.u32 4294901760, %v2450_v51  ;;  %v2542_v52 = vand.u32 4294901760, %v2541_v45 }
 0x61e   :  { %v8983_v56 = vpack.c.bf16 %v2462_v18, %v2459_v5  ;;  %v8996_v47 = vsub.f32 %v2450_v51, %v2462_v18 }
 0x61f   :  { %7557 = vmatpush3.bf16.msra.mxu1 %v7556_v40  ;;  %v9710_v40 = vand.u32 4294901760, %v9022_v7 }
 0x620   :  { %7558 = vmatprep.subr.bf16.mxu1 %v9721_v33  ;;  %v9711_v3 = vand.u32 4294901760, %v8996_v47 }
 0x621   :  { %v2530_v9 = vsub.f32 %v9022_v7, %v9710_v40 }
 0x622   :  { %6939 = vmatmul.mubr.f32.vlgmr.msra.gmra.mrb[0].mxu1 %v8390_v28  ;;  %v2548_v34 = vsub.f32 %v8996_v47, %v9711_v3 }
 0x623   :  { %7560 = vmatpush3.bf16.msra.mxu1 %v7529_v41  ;;  %6949 = vmatprep.mubr.msk.f32.mxu1 %vm8225_vm9, %v8852_v0  ;;  %v111_v41 = vld [vmem:[%s9701_s9 + $0x10] sm:$0xff]  ;;  %v2531_v20 = vand.u32 4294901760, %v2530_v9 }
 0x624   :  { %7561 = vmatprep.subr.bf16.mxu1 %v9721_v33  ;;  %v2953_v2 = vsel %vm1370_vm8, %v111_v41, 0  ;;  %v2549_v51 = vand.u32 4294901760, %v2548_v34 }
 0x625   :  { %v2965_v23 = vand.u32 4294901760, %v2953_v2 }
 0x626   :  { %v9057_v41 = vpack.c.bf16 %v2549_v51, %v2542_v52 }
 0x627   :  { %7563 = vmatpush3.bf16.msra.mxu1 %v7532_v43  ;;  %v2456_v43 = vsel %vm2442_vm10, %v108_v22, 0  ;;  %v9027_v58 = vpack.c.bf16 %v2968_v14, %v2965_v23  ;;  %v9053_v48 = vsub.f32 %v2953_v2, %v2965_v23  ;;  %v9055_v22 = vsub.f32 %v2956_v35, %v2968_v14 }
 0x628   :  { %7600 = vmatprep.subr.bf16.mxu1 %v9721_v33  ;;  %v2468_v10 = vand.u32 4294901760, %v2456_v43 }
 0x629   :  { %v9714_v34 = vand.u32 4294901760, %v9053_v48  ;;  %v9713_v9 = vand.u32 4294901760, %v9055_v22 }
 0x62a   :  { %6950 = vmatmul.mubr.f32.vlgmr.msra.gmra.mrb[0].mxu1 %v8390_v28  ;;  %v110_v28 = vld [vmem:[%s9701_s9 + $0x8] sm:$0xff]  ;;  %v9019_v50 = vpack.c.bf16 %v2468_v10, %v2465_v42 }
 0x62b   :  { %7026 = vmatprep.mubr.msk.f32.mxu1 %vm8225_vm9, %v8852_v0  ;;  %v2950_v12 = vsel %vm1370_vm8, %v110_v28, 0  ;;  %v3040_v28 = vand.u32 4294901760, %v9030_v36 }
 0x62c   :  { %v2962_v53 = vand.u32 4294901760, %v2950_v12 }
 0x62d   :  { %v3041_v18 = vsub.f32 %v9030_v36, %v3040_v28 }
 0x62e   :  { %v8998_v39 = vpack.c.bf16 %v2962_v53, %v2959_v8  ;;  %v9032_v44 = vsub.f32 %v2950_v12, %v2962_v53  ;;  %v9049_v8 = vsub.f32 %v2453_v37, %v2465_v42  ;;  %v9051_v53 = vsub.f32 %v2456_v43, %v2468_v10 }
 0x62f   :  { %v3042_v49 = vand.u32 4294901760, %v3041_v18  ;;  %v3055_v42 = vsub.f32 %v9053_v48, %v9714_v34  ;;  %v3062_v10 = vsub.f32 %v9055_v22, %v9713_v9 }
 0x630   :  { %7602 = vmatpush3.bf16.xpose.msra.mxu1 %v8983_v56  ;;  %7638 = vmatpush3.bf16.xpose.msra.mxu0 %v8998_v39  ;;  %v3047_v5 = vand.u32 4294901760, %v9032_v44  ;;  %v9709_v57 = vand.u32 4294901760, %v9049_v8  ;;  %v9708_v45 = vand.u32 4294901760, %v9051_v53 }
 0x631   :  { %7603 = vmatprep.subr.bf16.mxu1 %v9721_v33  ;;  %7639 = vmatprep.subr.bf16.mxu0 %v9721_v33 }
 0x632   :  { %v3048_v12 = vsub.f32 %v9032_v44, %v3047_v5  ;;  %v2555_v43 = vsub.f32 %v9049_v8, %v9709_v57  ;;  %v2562_v2 = vsub.f32 %v9051_v53, %v9708_v45 }
 0x634   :  { %v3049_v25 = vand.u32 4294901760, %v3048_v12  ;;  %v2556_v23 = vand.u32 4294901760, %v2555_v43  ;;  %v2563_v14 = vand.u32 4294901760, %v2562_v2  ;;  %v3056_v12 = vand.u32 4294901760, %v3055_v42 }
 0x636   :  { %v9063_v37 = vpack.c.bf16 %v3049_v25, %v3042_v49  ;;  %v3063_v49 = vand.u32 4294901760, %v3062_v10  ;;  %v9091_v9 = vpack.c.bf16 %v2563_v14, %v2556_v23 }
 0x638   :  { %7605 = vmatpush3.bf16.xpose.msra.mxu1 %v9019_v50  ;;  %7641 = vmatpush3.bf16.xpose.msra.mxu0 %v9027_v58  ;;  %v9094_v42 = vpack.c.bf16 %v3063_v49, %v3056_v12  ;;  %v9160_v49 = vpack.c.bf16 %v3047_v5, %v3040_v28  ;;  %v9734_v28 = vand.u32 4294901760, %v9051_v53 }
 0x639   :  { %7606 = vmatprep.subr.bf16.mxu1 %v9721_v33  ;;  %7642 = vmatprep.subr.bf16.mxu0 %v9721_v33 }
 0x63a   :  { %9726 = vst [vmem:[#allocation19_spill] sm:$0xff] %v9160_v49 }
 0x63f   :  { %7027 = vmatmul.mubr.f32.vlgmr.msra.gmra.mrb[2].mxu1 %v2531_v20 }
 0x640   :  { %7608 = vmatpush3.bf16.xpose.msra.mxu1 %v9057_v41  ;;  %7037 = vmatprep.mubr.msk.f32.mxu1 %vm8225_vm9, %v8852_v0 }
 0x641   :  { %7609 = vmatprep.subr.bf16.mxu1 %v9721_v33 }
 0x648   :  { %7611 = vmatpush3.bf16.xpose.msra.mxu1 %v9091_v9 }
 0x649   :  { %7612 = vmatprep.subr.bf16.mxu1 %v9721_v33 }
 0x64f   :  { %7038 = vmatmul.mubr.f32.vlgmr.msra.gmra.mrb[2].mxu1 %v9014_v55 }
 0x650   :  { %7048 = vmatprep.mubr.msk.f32.mxu1 %vm8225_vm9, %v8852_v0 }
 0x680   :  { %v4116_v35 = vpop.xlane.xlu0 %4115 }
 0x681   :  { %v4121_v52 = vrot.slane %v4116_v35, %v8447_v11  ;;  %v4125_v51 = vrot.slane %v4116_v35, %v8450_v13  ;;  %v4129_v20 = vrot.slane %v4116_v35, %v8548_v62  ;;  %v4133_v18 = vrot.slane %v4116_v35, %v8551_v63 }
 0x682   :  { %v4137_v25 = vrot.slane %v4116_v35, %v8557_v6  ;;  %v4141_v43 = vrot.slane %v4116_v35, %v8561_v21  ;;  %v4145_v34 = vrot.slane %v4116_v35, %v8565_v26  ;;  %v4149_v10 = vrot.slane %v4116_v35, %v8569_v29 }
 0x683   :  { %v4158_v45 = vsub.f32 %v8847_v30, %v4121_v52  ;;  %v4159_v57 = vsub.f32 %v8882_v32, %v4125_v51  ;;  %v4160_v40 = vsub.f32 %v8849_v61, %v4129_v20  ;;  %v4161_v2 = vsub.f32 %v8856_v38, %v4133_v18 }
 0x684   :  { %v4162_v30 = vsub.f32 %v8861_v15, %v4137_v25  ;;  %v4163_v61 = vsub.f32 %v8872_v46, %v4141_v43  ;;  %v4164_v15 = vsub.f32 %v8879_v31, %v4145_v34  ;;  %v4165_v46 = vsub.f32 %v8899_v54, %v4149_v10 }
 0x685   :  { %v4166_v3 = vmul.f32 1.442695, %v4158_v45  ;;  %v4168_v17 = vmul.f32 1.442695, %v4159_v57  ;;  %v4170_v32 = vmul.f32 1.442695, %v4160_v40  ;;  %v9103_v57 = vpack.c.bf16 %v9032_v44, %v9030_v36 }
 0x686   :  { %v4172_v38 = vmul.f32 1.442695, %v4161_v2  ;;  %v9107_v45 = vpack.c.bf16 %v9055_v22, %v9053_v48  ;;  %v9112_v40 = vpack.c.bf16 %v8996_v47, %v8994_v16  ;;  %v4178_v35 = vmul.f32 1.442695, %v4164_v15 }
 0x687   :  { %8024 = vpow2.f32 %v4166_v3  ;;  %9724 = vst [vmem:[#allocation17_spill] sm:$0xff] %v9103_v57  ;;  %v4174_v3 = vmul.f32 1.442695, %v4162_v30  ;;  %v4180_v31 = vmul.f32 1.442695, %v4165_v46  ;;  %v9128_v54 = vpack.c.bf16 %v9051_v53, %v9049_v8 }
 0x688   :  { %8026 = vpow2.f32 %v4168_v17  ;;  %9725 = vst [vmem:[#allocation18_spill] sm:$0xff] %v9107_v45  ;;  %v4176_v17 = vmul.f32 1.442695, %v4163_v61  ;;  %7614 = vmatpush3.bf16.xpose.msra.mxu1 %v9112_v40  ;;  %v9727_v25 = vand.u32 4294901760, %v9053_v48  ;;  %v9728_v43 = vand.u32 4294901760, %v9055_v22 }
 0x689   :  { %8028 = vpow2.f32 %v4170_v32  ;;  %7615 = vmatprep.subr.bf16.mxu1 %v9721_v33  ;;  %v9730_v10 = vand.u32 4294901760, %v8994_v16  ;;  %v9731_v30 = vand.u32 4294901760, %v8996_v47  ;;  %v9732_v36 = vand.u32 4294901760, %v9022_v7  ;;  %v6614_v16 = vld [vmem:[%s9699_s7] ss:$0 sm:$0xff] }
 0x68a   :  { %8030 = vpow2.f32 %v4172_v38  ;;  %v9167_v2 = vpack.c.bf16 %v9728_v43, %v9727_v25  ;;  %v9733_v44 = vand.u32 4294901760, %v9049_v8 }
 0x68b   :  { %8032 = vpow2.f32 %v4174_v3  ;;  %v9173_v32 = vpack.c.bf16 %v9731_v30, %v9730_v10 }
 0x68c   :  { %8034 = vpow2.f32 %v4176_v17  ;;  %9729 = vst [vmem:[#allocation20_spill] sm:$0xff] %v9167_v2  ;;  %v9185_v5 = vpack.c.bf16 %v9734_v28, %v9733_v44 }
 0x68d   :  { %8036 = vpow2.f32 %v4178_v35 }
 0x68e   :  { %8038 = vpow2.f32 %v4180_v31 }
 0x690   :  { %7617 = vmatpush3.bf16.xpose.msra.mxu1 %v9128_v54 }
 0x691   :  { %v9120_v34 = vpop.eup %8024  ;;  %7618 = vmatprep.subr.bf16.mxu1 %v9721_v33 }
 0x692   :  { %v9122_v23 = vpop.eup %8026  ;;  %4191 = vperm.xlu0 %7969, %v9120_v34  }
 0x693   :  { %4194 = vperm.xlu1 %7968, %v9122_v23   ;;  %v9130_v14 = vpop.eup %8028 }
 0x694   :  { %v9132_v52 = vpop.eup %8030 }
 0x695   :  { %v9138_v51 = vpop.eup %8032 }
 0x696   :  { %4197 = vperm.xlu0 %7969, %v9130_v14   ;;  %v9140_v20 = vpop.eup %8034 }
 0x697   :  { %4200 = vperm.xlu1 %7968, %v9132_v52   ;;  %v9144_v18 = vpop.eup %8036  ;;  %7049 = vmatmul.mubr.f32.vlgmr.msra.gmra.mrb[2].mxu1 %v9022_v7 }
 0x698   :  { %v9146_v12 = vpop.eup %8038  ;;  %7620 = vmatpush3.bf16.xpose.msra.mxu1 %v8983_v56  ;;  %7059 = vmatprep.mubr.msk.f32.mxu1 %vm8225_vm9, %v8852_v0 }
 0x699   :  { %7621 = vmatprep.subr.bf16.mxu1 %v9721_v33 }
 0x69a   :  { %4203 = vperm.xlu0 %7969, %v9138_v51  }
 0x69b   :  { %4206 = vperm.xlu1 %7968, %v9140_v20  }
 0x69e   :  { %4209 = vperm.xlu0 %7969, %v9144_v18  }
 0x69f   :  { %4212 = vperm.xlu1 %7968, %v9146_v12  }
 0x6a0   :  { %7623 = vmatpush3.bf16.xpose.msra.mxu1 %v9019_v50 }
 0x6a1   :  { %7624 = vmatprep.subr.bf16.mxu1 %v9721_v33 }
 0x6a7   :  { %7060 = vmatmul.mubr.f32.vlgmr.msra.gmra.mrb[2].mxu1 %v9732_v36 }
 0x6a8   :  { %7626 = vmatpush3.bf16.xpose.msra.mxu1 %v9173_v32  ;;  %7070 = vmatprep.mubr.msk.f32.mxu1 %vm8225_vm9, %v8852_v0 }
 0x6a9   :  { %7627 = vmatprep.subr.bf16.mxu1 %v9721_v33 }
 0x6b0   :  { %7629 = vmatpush3.bf16.xpose.msra.mxu1 %v9185_v5 }
 0x6b1   :  { %7630 = vmatprep.subr.bf16.mxu1 %v9721_v33 }
 0x6b7   :  { %7071 = vmatmul.mubr.f32.vlgmr.msra.gmra.mrb[2].mxu1 %v9014_v55 }
 0x6b8   :  { %7632 = vmatpush3.bf16.xpose.msra.mxu1 %v8983_v56  ;;  %7081 = vmatprep.mubr.msk.f32.mxu1 %vm8225_vm9, %v8852_v0 }
 0x6b9   :  { %7633 = vmatprep.subr.bf16.mxu1 %v9721_v33 }
 0x6c0   :  { %7635 = vmatpush3.bf16.xpose.msra.mxu1 %v9019_v50 }
 0x6c1   :  { %7672 = vmatprep.subr.bf16.mxu1 %v9721_v33 }
 0x6c7   :  { %7082 = vmatmul.mubr.f32.vlgmr.msra.gmra.mrb[2].mxu1 %v9014_v55 }
 0x6c8   :  { %7158 = vmatprep.mubr.msk.f32.mxu1 %vm8225_vm9, %v8852_v0 }
 0x6cd   :  { %v2431_v47 = vpop.f32.mrb[2].mxu0 }
 0x6ce   :  { %v7855_v7 = vadd.f32 %v6614_v16, %v2431_v47  ;;  %v7017_v8 = vpop.f32.mrb[3].mxu0 }
 0x6d0   :  { %v2435_v53 = vsub.f32 0.0, %v7855_v7 }
 0x6d2   :  { %v2436_v48 = vmul.f32 1.442695, %v2435_v53 }
 0x6d4   :  { %8040 = vpow2.f32 %v2436_v48 }
 0x6de   :  { %v8041_v22 = vpop.eup %8040 }
 0x6df   :  { %v2438_v61 = vadd.f32 1.0, %v8041_v22 }
 0x6e1   :  { %8042 = vrcp.f32 %v2438_v61 }
 0x6eb   :  { %v8043_v38 = vpop.eup %8042 }
 0x6ec   :  { %2441 = vst.msk [vmem:[#allocation10 + $0x28] sm:$0xff] %vm1370_vm8, %v8043_v38  ;;  %v2944_v15 = vsel %vm1370_vm8, %v8043_v38, 0 }
 0x6ed   :  { %v3027_v3 = vand.u32 4294901760, %v2944_v15 }
 0x6ef   :  { %v3028_v46 = vsub.f32 %v2944_v15, %v3027_v3 }
 0x6f1   :  { %v3029_v17 = vand.u32 4294901760, %v3028_v46 }
 0x6f3   :  { %v3030_v35 = vsub.f32 %v3028_v46, %v3029_v17 }
 0x6f5   :  { %v3031_v31 = vand.u32 4294901760, %v3030_v35 }
 0x6f7   :  { %7093 = vmatmul.mubr.f32.vlgmr.msra.gmra.mrb[4].mxu0 %v3031_v31 }
 0x6f8   :  { %7644 = vmatpush3.bf16.xpose.msra.mxu0 %v9063_v37  ;;  %7103 = vmatprep.mubr.msk.f32.mxu0 %vm8225_vm9, %v8852_v0 }
 0x6f9   :  { %7645 = vmatprep.subr.bf16.mxu0 %v9721_v33 }
 0x700   :  { %7647 = vmatpush3.bf16.xpose.msra.mxu0 %v9094_v42 }
 0x701   :  { %7648 = vmatprep.subr.bf16.mxu0 %v9721_v33 }
 0x707   :  { %7104 = vmatmul.mubr.f32.vlgmr.msra.gmra.mrb[4].mxu0 %v3027_v3 }
 0x708   :  { %7650 = vmatpush3.bf16.xpose.msra.mxu0 %v9103_v57  ;;  %7114 = vmatprep.mubr.msk.f32.mxu0 %vm8225_vm9, %v8852_v0 }
 0x709   :  { %7651 = vmatprep.subr.bf16.mxu0 %v9721_v33 }
 0x710   :  { %7653 = vmatpush3.bf16.xpose.msra.mxu0 %v9107_v45 }
 0x711   :  { %v4192_v55 = vpop.permute.xlu0 %4191  ;;  %7654 = vmatprep.subr.bf16.mxu0 %v9721_v33 }
 0x712   :  { %v4195_v25 = vpop.permute.xlu1 %4194  ;;  %v4217_v10 = vrot.slane %v4192_v55, %v8529_v27 }
 0x713   :  { %v4221_v43 = vrot.slane %v4195_v25, %v8529_v27 }
 0x715   :  { %v4198_v30 = vpop.permute.xlu0 %4197  ;;  %v4246_v28 = vsel %vm1355_vm1, %v4221_v43, %v4217_v10 }
 0x716   :  { %v4201_v36 = vpop.permute.xlu1 %4200  ;;  %v4225_v44 = vrot.slane %v4198_v30, %v8529_v27 }
 0x717   :  { %v4229_v16 = vrot.slane %v4201_v36, %v8529_v27  ;;  %7115 = vmatmul.mubr.f32.vlgmr.msra.gmra.mrb[4].mxu0 %v3028_v46  ;;  %v113_v36 = vld [vmem:[%s9702_s10] sm:$0xff] }
 0x718   :  { %v4247_v47 = vsel %vm1357_vm2, %v4225_v44, %v4246_v28  ;;  %7656 = vmatpush3.bf16.xpose.msra.mxu0 %v8998_v39  ;;  %7125 = vmatprep.mubr.msk.f32.mxu0 %vm8225_vm9, %v8852_v0  ;;  %v114_v44 = vld [vmem:[%s9702_s10 + $0x8] sm:$0xff] }
 0x719   :  { %v4204_v7 = vpop.permute.xlu0 %4203  ;;  %7657 = vmatprep.subr.bf16.mxu0 %v9721_v33  ;;  %v4248_v22 = vsel %vm1359_vm3, %v4229_v16, %v4247_v47  ;;  %v3448_v16 = vand.u32 4294901760, %v113_v36  ;;  %v3451_v47 = vand.u32 4294901760, %v114_v44 }
 0x71a   :  { %v4207_v8 = vpop.permute.xlu1 %4206  ;;  %v4233_v53 = vrot.slane %v4204_v7, %v8529_v27  ;;  %v116_v7 = vld [vmem:[%s9702_s10 + $0x18] sm:$0xff] }
 0x71b   :  { %v4237_v48 = vrot.slane %v4207_v8, %v8529_v27 }
 0x71c   :  { %v4249_v61 = vsel %vm1361_vm4, %v4233_v53, %v4248_v22  ;;  %v3457_v53 = vand.u32 4294901760, %v116_v7  ;;  %v3528_v22 = vsub.f32 %v113_v36, %v3448_v16 }
 0x71d   :  { %v4210_v38 = vpop.permute.xlu0 %4209  ;;  %v4250_v31 = vsel %vm1363_vm5, %v4237_v48, %v4249_v61  ;;  %v9268_v48 = vpack.c.bf16 %v3451_v47, %v3448_v16  ;;  %v3535_v61 = vsub.f32 %v114_v44, %v3451_v47 }
 0x71e   :  { %v4213_v15 = vpop.permute.xlu1 %4212  ;;  %v4241_v46 = vrot.slane %v4210_v38, %v8529_v27 }
 0x71f   :  { %v4245_v35 = vrot.slane %v4213_v15, %v8529_v27  ;;  %7674 = vmatpush3.bf16.msra.mxu1 %v9268_v48  ;;  %v3529_v15 = vand.u32 4294901760, %v3528_v22  ;;  %v9278_v57 = vpack.c.bf16 %v3535_v61, %v3528_v22 }
 0x720   :  { %7659 = vmatpush3.bf16.xpose.msra.mxu0 %v9027_v58  ;;  %v4251_v55 = vsel %vm1365_vm6, %v4241_v46, %v4250_v31  ;;  %v3536_v46 = vand.u32 4294901760, %v3535_v61  ;;  %7675 = vmatprep.subr.bf16.mxu1 %v9721_v33 }
 0x721   :  { %v4252_v25 = vsel %vm1367_vm7, %v4245_v35, %v4251_v55  ;;  %7660 = vmatprep.subr.bf16.mxu0 %v9721_v33  ;;  %v3530_v35 = vsub.f32 %v3528_v22, %v3529_v15 }
 0x722   :  { %v4254_v43 = vsel %vm1370_vm8, %v4252_v25, 0.0  ;;  %v3537_v31 = vsub.f32 %v3535_v61, %v3536_v46  ;;  %v3549_v25 = vsub.f32 %v116_v7, %v3457_v53 }
 0x723   :  { %4255 = vadd.xlane.f32.xlu0 %v4254_v43  ;;  %v3531_v43 = vand.u32 4294901760, %v3530_v35 }
 0x727   :  { %7126 = vmatmul.mubr.f32.vlgmr.msra.gmra.mrb[4].mxu0 %v3029_v17  ;;  %v9252_v17 = vpop.f32.mrb[0].mxu1 }
 0x728   :  { %7662 = vmatpush3.bf16.xpose.msra.mxu0 %v9160_v49  ;;  %7136 = vmatprep.mubr.msk.f32.mxu0 %vm8225_vm9, %v8852_v0  ;;  %v6951_v10 = vpop.f32.mrb[1].mxu1 }
 0x729   :  { %7663 = vmatprep.subr.bf16.mxu0 %v9721_v33  ;;  %v3538_v10 = vand.u32 4294901760, %v3537_v31 }
 0x72b   :  { %v9276_v36 = vpack.c.bf16 %v3538_v10, %v3531_v43 }
 0x730   :  { %7665 = vmatpush3.bf16.xpose.msra.mxu0 %v9167_v2  ;;  %v3550_v2 = vand.u32 4294901760, %v3549_v25 }
 0x731   :  { %7666 = vmatprep.subr.bf16.mxu0 %v9721_v33 }
 0x732   :  { %v3551_v16 = vsub.f32 %v3549_v25, %v3550_v2 }
 0x734   :  { %v3552_v49 = vand.u32 4294901760, %v3551_v16 }
 0x737   :  { %7137 = vmatmul.mubr.f32.vlgmr.msra.gmra.mrb[4].mxu0 %v3027_v3 }
 0x738   :  { %7668 = vmatpush3.bf16.xpose.msra.mxu0 %v8998_v39  ;;  %7147 = vmatprep.mubr.msk.f32.mxu0 %vm8225_vm9, %v8852_v0 }
 0x739   :  { %7669 = vmatprep.subr.bf16.mxu0 %v9721_v33 }
 0x740   :  { %7671 = vmatpush3.bf16.xpose.msra.mxu0 %v9027_v58 }
 0x741   :  { %7708 = vmatprep.subr.bf16.mxu0 %v9721_v33 }
 0x747   :  { %7148 = vmatmul.mubr.f32.vlgmr.msra.gmra.mrb[4].mxu0 %v3027_v3  ;;  %v115_v3 = vld [vmem:[%s9702_s10 + $0x10] sm:$0xff] }
 0x748   :  { %7224 = vmatprep.mubr.msk.f32.mxu0 %vm8225_vm9, %v8852_v0  ;;  %v3454_v8 = vand.u32 4294901760, %v115_v3 }
 0x74a   :  { %v9271_v38 = vpack.c.bf16 %v3457_v53, %v3454_v8  ;;  %v3542_v55 = vsub.f32 %v115_v3, %v3454_v8 }
 0x74c   :  { %7677 = vmatpush3.bf16.msra.mxu1 %v9271_v38  ;;  %v9285_v35 = vpack.c.bf16 %v3549_v25, %v3542_v55 }
 0x74d   :  { %7678 = vmatprep.subr.bf16.mxu1 %v9721_v33 }
 0x79a   :  { %v9254_v30 = vpop.f32.mrb[2].mxu1 }
 0x79b   :  { %v7083_v28 = vpop.f32.mrb[3].mxu1 }
 0x79c   :  { %v3543_v28 = vand.u32 4294901760, %v3542_v55 }
 0x79e   :  { %v3544_v44 = vsub.f32 %v3542_v55, %v3543_v28  ;;  %v9295_v55 = vpack.c.bf16 %v3536_v46, %v3529_v15 }
 0x7a0   :  { %v3545_v47 = vand.u32 4294901760, %v3544_v44 }
 0x7a2   :  { %v9283_v53 = vpack.c.bf16 %v3552_v49, %v3545_v47  ;;  %v9298_v47 = vpack.c.bf16 %v3550_v2, %v3543_v28 }
 0x7b0   :  { %v4256_v45 = vpop.xlane.xlu0 %4255 }
 0x7b1   :  { %v4261_v3 = vrot.slane %v4256_v45, %v8447_v11  ;;  %v4265_v7 = vrot.slane %v4256_v45, %v8450_v13  ;;  %v4269_v8 = vrot.slane %v4256_v45, %v8548_v62  ;;  %v4273_v31 = vrot.slane %v4256_v45, %v8551_v63 }
 0x7b2   :  { %v4277_v43 = vrot.slane %v4256_v45, %v8557_v6  ;;  %v4281_v44 = vrot.slane %v4256_v45, %v8561_v21 }
 0x7b3   :  { %8044 = vrcp.f32 %v4261_v3  ;;  %v4285_v3 = vrot.slane %v4256_v45, %v8565_v26 }
 0x7b4   :  { %8046 = vrcp.f32 %v4265_v7 }
 0x7b5   :  { %8048 = vrcp.f32 %v4269_v8 }
 0x7b6   :  { %8050 = vrcp.f32 %v4273_v31 }
 0x7b7   :  { %8052 = vrcp.f32 %v4277_v43 }
 0x7b8   :  { %8054 = vrcp.f32 %v4281_v44 }
 0x7b9   :  { %8056 = vrcp.f32 %v4285_v3 }
 0x7bd   :  { %v8045_v22 = vpop.eup %8044 }
 0x7be   :  { %v8047_v61 = vpop.eup %8046  ;;  %v4299_v10 = vmul.f32 %v8045_v22, %v9120_v34 }
 0x7bf   :  { %v4301_v49 = vmul.f32 %v8047_v61, %v9122_v23  ;;  %v8049_v25 = vpop.eup %8048 }
 0x7c0   :  { %v9292_v16 = vmul.f32 %v4299_v10, %v8621_v59  ;;  %v4303_v7 = vmul.f32 %v8049_v25, %v9130_v14  ;;  %v8051_v8 = vpop.eup %8050  ;;  %v4289_v59 = vrot.slane %v4256_v45, %v8569_v29 }
 0x7c1   :  { %v9302_v34 = vmul.f32 %v4301_v49, %v8623_v60  ;;  %v4305_v2 = vmul.f32 %v8051_v8, %v9132_v52  ;;  %v8053_v15 = vpop.eup %8052 }
 0x7c2   :  { %4331 = vperm.xlu1 %7968, %v9292_v16   ;;  %v9308_v23 = vmul.f32 %v4303_v7, %v8625_v1  ;;  %8058 = vrcp.f32 %v4289_v59  ;;  %v4307_v14 = vmul.f32 %v8053_v15, %v9138_v51  ;;  %v8055_v46 = vpop.eup %8054  ;;  %v9735_v51 = vld [vmem:[#allocation15_spill] sm:$0xff] }
 0x7c3   :  { %v9313_v60 = vmul.f32 %v4305_v2, %v8627_v4  ;;  %v4309_v1 = vmul.f32 %v8055_v46, %v9140_v20  ;;  %v8057_v45 = vpop.eup %8056 }
 0x7c4   :  { %v9318_v28 = vmul.f32 %v4307_v14, %v8634_v19  ;;  %v4311_v31 = vmul.f32 %v8057_v45, %v9144_v18  ;;  %v9736_v19 = vld [vmem:[#allocation16_spill] sm:$0xff] }
 0x7c5   :  { %v9323_v52 = vmul.f32 %v4309_v1, %v8638_v24 }
 0x7c6   :  { %4334 = vperm.xlu1 %7968, %v9302_v34   ;;  %v9328_v43 = vmul.f32 %v4311_v31, %v9735_v51 }
 0x7ca   :  { %4337 = vperm.xlu1 %7968, %v9308_v23  }
 0x7cc   :  { %v8059_v4 = vpop.eup %8058 }
 0x7cd   :  { %v4313_v22 = vmul.f32 %v8059_v4, %v9146_v12 }
 0x7ce   :  { %4340 = vperm.xlu1 %7968, %v9313_v60  }
 0x7cf   :  { %v9333_v20 = vmul.f32 %v4313_v22, %v9736_v19 }
 0x7d2   :  { %4343 = vperm.xlu1 %7968, %v9318_v28  }
 0x7d6   :  { %4346 = vperm.xlu1 %7968, %v9323_v52  }
 0x7da   :  { %4349 = vperm.xlu1 %7968, %v9328_v43  }
 0x7de   :  { %4352 = vperm.xlu1 %7968, %v9333_v20  }
 0x81a   :  { %v3439_v61 = vpop.f32.mrb[4].mxu0 }
 0x81b   :  { %v3443_v24 = vmul.f32 %v3439_v61, %v9254_v30  ;;  %v7149_v10 = vpop.f32.mrb[5].mxu0 }
 0x81d   :  { %v3445_v18 = vsel %vm146_vm0, %v3443_v24, 0 }
 0x81e   :  { %v3516_v44 = vand.u32 4294901760, %v3445_v18 }
 0x820   :  { %v3517_v49 = vsub.f32 %v3445_v18, %v3516_v44 }
 0x822   :  { %v3518_v25 = vand.u32 4294901760, %v3517_v49 }
 0x824   :  { %v3519_v3 = vsub.f32 %v3517_v49, %v3518_v25 }
 0x826   :  { %v3520_v7 = vand.u32 4294901760, %v3519_v3 }
 0x828   :  { %7159 = vmatmul.mubr.f32.vlgmr.msra.gmra.mrb[4].mxu1 %v3520_v7 }
 0x829   :  { %7680 = vmatpush3.bf16.msra.mxu1 %v9276_v36  ;;  %7169 = vmatprep.mubr.msk.f32.mxu1 %vm8225_vm9, %v8852_v0 }
 0x82a   :  { %7681 = vmatprep.subr.bf16.mxu1 %v9721_v33 }
 0x82d   :  { %7683 = vmatpush3.bf16.msra.mxu1 %v9283_v53 }
 0x82e   :  { %7684 = vmatprep.subr.bf16.mxu1 %v9721_v33 }
 0x830   :  { %7170 = vmatmul.mubr.f32.vlgmr.msra.gmra.mrb[4].mxu1 %v3516_v44 }
 0x831   :  { %7686 = vmatpush3.bf16.msra.mxu1 %v9278_v57  ;;  %7180 = vmatprep.mubr.msk.f32.mxu1 %vm8225_vm9, %v8852_v0 }
 0x832   :  { %7687 = vmatprep.subr.bf16.mxu1 %v9721_v33 }
 0x835   :  { %7689 = vmatpush3.bf16.msra.mxu1 %v9285_v35 }
 0x836   :  { %7690 = vmatprep.subr.bf16.mxu1 %v9721_v33 }
 0x838   :  { %7181 = vmatmul.mubr.f32.vlgmr.msra.gmra.mrb[4].mxu1 %v3517_v49 }
 0x839   :  { %7692 = vmatpush3.bf16.msra.mxu1 %v9268_v48  ;;  %7191 = vmatprep.mubr.msk.f32.mxu1 %vm8225_vm9, %v8852_v0 }
 0x83a   :  { %7693 = vmatprep.subr.bf16.mxu1 %v9721_v33 }
 0x83d   :  { %7695 = vmatpush3.bf16.msra.mxu1 %v9271_v38 }
 0x83e   :  { %7696 = vmatprep.subr.bf16.mxu1 %v9721_v33 }
 0x840   :  { %7192 = vmatmul.mubr.f32.vlgmr.msra.gmra.mrb[4].mxu1 %v3518_v25 }
 0x841   :  { %7698 = vmatpush3.bf16.msra.mxu1 %v9295_v55  ;;  %v4332_v12 = vpop.permute.xlu1 %4331  ;;  %7202 = vmatprep.mubr.msk.f32.mxu1 %vm8225_vm9, %v8852_v0 }
 0x842   :  { %7699 = vmatprep.subr.bf16.mxu1 %v9721_v33  ;;  %v4357_v1 = vrot.slane %v4332_v12, %v8529_v27 }
 0x845   :  { %7701 = vmatpush3.bf16.msra.mxu1 %v9298_v47  ;;  %v4335_v30 = vpop.permute.xlu1 %4334 }
 0x846   :  { %7702 = vmatprep.subr.bf16.mxu1 %v9721_v33  ;;  %v4361_v14 = vrot.slane %v4335_v30, %v8529_v27 }
 0x848   :  { %7203 = vmatmul.mubr.f32.vlgmr.msra.gmra.mrb[4].mxu1 %v3516_v44  ;;  %v4386_v51 = vsel %vm1355_vm1, %v4361_v14, %v4357_v1 }
 0x849   :  { %7704 = vmatpush3.bf16.msra.mxu1 %v9268_v48  ;;  %v4338_v8 = vpop.permute.xlu1 %4337  ;;  %7213 = vmatprep.mubr.msk.f32.mxu1 %vm8225_vm9, %v8852_v0 }
 0x84a   :  { %7705 = vmatprep.subr.bf16.mxu1 %v9721_v33  ;;  %v4365_v46 = vrot.slane %v4338_v8, %v8529_v27 }
 0x84c   :  { %v4387_v22 = vsel %vm1357_vm2, %v4365_v46, %v4386_v51 }
 0x84d   :  { %7707 = vmatpush3.bf16.msra.mxu1 %v9271_v38  ;;  %v4341_v59 = vpop.permute.xlu1 %4340 }
 0x84e   :  { %7744 = vmatprep.subr.bf16.mxu1 %v9721_v33  ;;  %v4369_v45 = vrot.slane %v4341_v59, %v8529_v27 }
 0x850   :  { %7214 = vmatmul.mubr.f32.vlgmr.msra.gmra.mrb[4].mxu1 %v3516_v44  ;;  %v4388_v61 = vsel %vm1359_vm3, %v4369_v45, %v4387_v22 }
 0x851   :  { %v4344_v2 = vpop.permute.xlu1 %4343  ;;  %7290 = vmatprep.mubr.msk.f32.mxu1 %vm8225_vm9, %v8852_v0 }
 0x852   :  { %v4373_v31 = vrot.slane %v4344_v2, %v8529_v27 }
 0x854   :  { %v4389_v24 = vsel %vm1361_vm4, %v4373_v31, %v4388_v61 }
 0x855   :  { %v4347_v15 = vpop.permute.xlu1 %4346 }
 0x856   :  { %7746 = vmatpush3.bf16.xpose.msra.mxu1 %v8983_v56  ;;  %v4377_v0 = vrot.slane %v4347_v15, %v8529_v27 }
 0x857   :  { %7747 = vmatprep.subr.bf16.mxu1 %v9721_v33 }
 0x858   :  { %v4390_v18 = vsel %vm1363_vm5, %v4377_v0, %v4389_v24 }
 0x859   :  { %v4350_v4 = vpop.permute.xlu1 %4349 }
 0x85a   :  { %v4381_v19 = vrot.slane %v4350_v4, %v8529_v27 }
 0x85c   :  { %v4391_v49 = vsel %vm1365_vm6, %v4381_v19, %v4390_v18 }
 0x85d   :  { %v4353_v10 = vpop.permute.xlu1 %4352 }
 0x85e   :  { %v4385_v44 = vrot.slane %v4353_v10, %v8529_v27  ;;  %7749 = vmatpush3.bf16.xpose.msra.mxu1 %v9019_v50 }
 0x85f   :  { %7750 = vmatprep.subr.bf16.mxu1 %v9721_v33 }
 0x860   :  { %v4392_v25 = vsel %vm1367_vm7, %v4385_v44, %v4391_v49 }
 0x861   :  { %v4394_v3 = vsel %vm1370_vm8, %v4392_v25, 0.0 }
 0x862   :  { %4395 = vadd.xlane.f32.xlu0 %v4394_v3 }
 0x8ef   :  { %v4396_v7 = vpop.xlane.xlu0 %4395 }
 0x8f0   :  { %v4397_v12 = vadd.f32 1e-06, %v4396_v7 }
 0x8f2   :  { %v4406_v30 = vrot.slane %v4397_v12, %v8450_v13  ;;  %v4402_v8 = vrot.slane %v4397_v12, %v8447_v11  ;;  %v4430_v59 = vrot.slane %v4397_v12, %v8569_v29  ;;  %v4410_v2 = vrot.slane %v4397_v12, %v8548_v62 }
 0x8f3   :  { %v4414_v15 = vrot.slane %v4397_v12, %v8551_v63  ;;  %v4418_v14 = vrot.slane %v4397_v12, %v8557_v6  ;;  %v4422_v11 = vrot.slane %v4397_v12, %v8561_v21  ;;  %v4426_v63 = vrot.slane %v4397_v12, %v8565_v26 }
 0x8f4   :  { %8060 = vrcp.f32 %v4406_v30 }
 0x8f5   :  { %8062 = vrcp.f32 %v4402_v8 }
 0x8f6   :  { %8064 = vrcp.f32 %v4430_v59  ;;  %v8089_v59 = vld [vmem:[#allocation8] sm:$0x7] }
 0x8f7   :  { %8066 = vrcp.f32 %v4410_v2  ;;  %v142_v2 = vrot.slane %v8089_v59, %v8548_v62 }
 0x8f8   :  { %8068 = vrcp.f32 %v4414_v15 }
 0x8f9   :  { %8070 = vrcp.f32 %v4418_v14  ;;  %v9446_v62 = vadd.f32 %v9252_v17, %v142_v2 }
 0x8fa   :  { %8072 = vrcp.f32 %v4422_v11 }
 0x8fb   :  { %8074 = vrcp.f32 %v4426_v63  ;;  %v1179_v17 = vsel %vm1178_vm11, %v9446_v62, -inf }
 0x8fe   :  { %v8061_v46 = vpop.eup %8060 }
 0x8ff   :  { %v8063_v1 = vpop.eup %8062  ;;  %v4442_v45 = vmul.f32 %v8061_v46, %v9302_v34 }
 0x900   :  { %v8065_v13 = vpop.eup %8064  ;;  %v4440_v29 = vmul.f32 %v8063_v1, %v9292_v16 }
 0x901   :  { %v8067_v31 = vpop.eup %8066  ;;  %4467 = vperm.xlu0 %7969, %v4442_v45   ;;  %v4454_v4 = vmul.f32 %v8065_v13, %v9333_v20 }
 0x902   :  { %4464 = vperm.xlu1 %7968, %v4440_v29   ;;  %v4444_v6 = vmul.f32 %v8067_v31, %v9308_v23  ;;  %v8069_v51 = vpop.eup %8068 }
 0x903   :  { %v4446_v34 = vmul.f32 %v8069_v51, %v9313_v60  ;;  %v8071_v21 = vpop.eup %8070  ;;  %v4600_v60 = vld [vmem:[%s9698_s6] sm:$0xff] }
 0x904   :  { %v4448_v16 = vmul.f32 %v8071_v21, %v9318_v28  ;;  %v8073_v0 = vpop.eup %8072  ;;  %v4601_v28 = vld [vmem:[%s9698_s6 + $0x8] sm:$0xff]  ;;  %v4629_v24 = vand.u32 4294901760, %v4600_v60 }
 0x905   :  { %4485 = vperm.xlu0 %7969, %v4454_v4   ;;  %v4450_v22 = vmul.f32 %v8073_v0, %v9323_v52  ;;  %v8075_v20 = vpop.eup %8074  ;;  %v4602_v52 = vld [vmem:[%s9698_s6 + $0x10] sm:$0xff]  ;;  %v4632_v10 = vand.u32 4294901760, %v4601_v28 }
 0x906   :  { %4470 = vperm.xlu1 %7968, %v4444_v6   ;;  %v4452_v26 = vmul.f32 %v8075_v20, %v9328_v43  ;;  %v4603_v43 = vld [vmem:[%s9698_s6 + $0x18] sm:$0xff]  ;;  %v4635_v18 = vand.u32 4294901760, %v4602_v52  ;;  %v9420_v25 = vsub.f32 %v4600_v60, %v4629_v24 }
 0x907   :  { %v4638_v44 = vand.u32 4294901760, %v4603_v43  ;;  %v9418_v49 = vpack.c.bf16 %v4632_v10, %v4629_v24  ;;  %v9422_v3 = vsub.f32 %v4601_v28, %v4632_v10  ;;  %v9466_v60 = vld [vmem:[#allocation10] sm:$0xff] }
 0x908   :  { %v9424_v7 = vsub.f32 %v4602_v52, %v4635_v18  ;;  %v4710_v14 = vand.u32 4294901760, %v9420_v25 }
 0x909   :  { %v9426_v12 = vsub.f32 %v4603_v43, %v4638_v44  ;;  %7710 = vmatpush3.bf16.msra.mxu0 %v9418_v49  ;;  %v9429_v30 = vpack.c.bf16 %v4638_v44, %v4635_v18  ;;  %v4717_v46 = vand.u32 4294901760, %v9422_v3  ;;  %v8093_v18 = vld [vmem:[%s9693_s1 + $0x10] sm:$0xff] }
 0x90a   :  { %4473 = vperm.xlu1 %7968, %v4446_v34   ;;  %7711 = vmatprep.subr.bf16.mxu0 %v9721_v33  ;;  %v4711_v45 = vsub.f32 %v9420_v25, %v4710_v14  ;;  %v4724_v4 = vand.u32 4294901760, %v9424_v7 }
 0x90b   :  { %v4718_v11 = vsub.f32 %v9422_v3, %v4717_v46  ;;  %v4731_v63 = vand.u32 4294901760, %v9426_v12  ;;  %v9473_v28 = vpack.c.bf16 %v4717_v46, %v4710_v14  ;;  %v8094_v14 = vld [vmem:[%s9693_s1 + $0x38] sm:$0xff] }
 0x90c   :  { %v4712_v29 = vand.u32 4294901760, %v4711_v45  ;;  %v4725_v34 = vsub.f32 %v9424_v7, %v4724_v4 }
 0x90d   :  { %7713 = vmatpush3.bf16.msra.mxu0 %v9429_v30  ;;  %v4719_v31 = vand.u32 4294901760, %v4718_v11  ;;  %v4732_v21 = vsub.f32 %v9426_v12, %v4731_v63  ;;  %v9475_v52 = vpack.c.bf16 %v4731_v63, %v4724_v4  ;;  %v8095_v11 = vld [vmem:[%s9693_s1 + $0x18] sm:$0xff] }
 0x90e   :  { %4476 = vperm.xlu1 %7968, %v4448_v16   ;;  %7714 = vmatprep.subr.bf16.mxu0 %v9721_v33  ;;  %v4726_v0 = vand.u32 4294901760, %v4725_v34 }
 0x90f   :  { %v9453_v51 = vpack.c.bf16 %v4719_v31, %v4712_v29 }
 0x912   :  { %4479 = vperm.xlu1 %7968, %v4450_v22   ;;  %v4733_v22 = vand.u32 4294901760, %v4732_v21 }
 0x916   :  { %4482 = vperm.xlu1 %7968, %v4452_v26   ;;  %v9459_v26 = vpack.c.bf16 %v4733_v22, %v4726_v0 }
 0x923   :  { %v3928_v23 = vpop.f32.mrb[4].mxu1 }
 0x924   :  { %v3932_v19 = vmax.f32 %v3928_v23, 1.0  ;;  %v7215_v61 = vpop.f32.mrb[5].mxu1 }
 0x925   :  { %v7724_v61 = vpack.c.bf16 %v9426_v12, %v9424_v7 }
 0x926   :  { %8076 = vrcp.f32 %v3932_v19 }
 0x930   :  { %v8077_v8 = vpop.eup %8076 }
 0x931   :  { %v9435_v15 = vmul.f32 %v8077_v8, %v3928_v23  ;;  %v7721_v23 = vpack.c.bf16 %v9422_v3, %v9420_v25 }
 0x933   :  { %3935 = vst.msk [vmem:[#allocation10 + $0x8] sm:$0xff] %vm2442_vm10, %v9435_v15  ;;  %v5121_v1 = vsel %vm2442_vm10, %v9435_v15, 0 }
 0x934   :  { %v9448_v13 = vand.u32 4294901760, %v5121_v1 }
 0x936   :  { %v5193_v6 = vsub.f32 %v5121_v1, %v9448_v13 }
 0x938   :  { %v5194_v16 = vand.u32 4294901760, %v5193_v6 }
 0x93a   :  { %1180 = vmax.xlane.f32.xlu1 %v1179_v17  ;;  %v5195_v20 = vsub.f32 %v5193_v6, %v5194_v16 }
 0x93c   :  { %v5196_v19 = vand.u32 4294901760, %v5195_v20 }
 0x93e   :  { %7291 = vmatmul.mubr.f32.vlgmr.msra.gmra.mrb[6].mxu1 %v5196_v19 }
 0x93f   :  { %7752 = vmatpush3.bf16.xpose.msra.mxu1 %v9057_v41  ;;  %7301 = vmatprep.mubr.msk.f32.mxu1 %vm8225_vm9, %v9466_v60 }
 0x940   :  { %7753 = vmatprep.subr.bf16.mxu1 %v9721_v33 }
 0x947   :  { %7755 = vmatpush3.bf16.xpose.msra.mxu1 %v9091_v9  ;;  %v8091_v9 = vld [vmem:[%s9693_s1 + $0x8] sm:$0xff] }
 0x948   :  { %7756 = vmatprep.subr.bf16.mxu1 %v9721_v33 }
 0x94e   :  { %7302 = vmatmul.mubr.f32.vlgmr.msra.gmra.mrb[6].mxu1 %v9448_v13 }
 0x94f   :  { %7758 = vmatpush3.bf16.xpose.msra.mxu1 %v9112_v40  ;;  %7312 = vmatprep.mubr.msk.f32.mxu1 %vm8225_vm9, %v9466_v60 }
 0x950   :  { %7759 = vmatprep.subr.bf16.mxu1 %v9721_v33 }
 0x957   :  { %7761 = vmatpush3.bf16.xpose.msra.mxu1 %v9128_v54 }
 0x958   :  { %7762 = vmatprep.subr.bf16.mxu1 %v9721_v33 }
 0x95e   :  { %7313 = vmatmul.mubr.f32.vlgmr.msra.gmra.mrb[6].mxu1 %v5193_v6 }
 0x95f   :  { %7764 = vmatpush3.bf16.xpose.msra.mxu1 %v8983_v56  ;;  %7323 = vmatprep.mubr.msk.f32.mxu1 %vm8225_vm9, %v9466_v60 }
 0x960   :  { %7765 = vmatprep.subr.bf16.mxu1 %v9721_v33 }
 0x967   :  { %7767 = vmatpush3.bf16.xpose.msra.mxu1 %v9019_v50 }
 0x968   :  { %7768 = vmatprep.subr.bf16.mxu1 %v9721_v33 }
 0x96e   :  { %7324 = vmatmul.mubr.f32.vlgmr.msra.gmra.mrb[6].mxu1 %v5194_v16  ;;  %v8096_v16 = vld [vmem:[%s9693_s1 + $0x20] sm:$0xff] }
 0x96f   :  { %7770 = vmatpush3.bf16.xpose.msra.mxu1 %v9173_v32  ;;  %7334 = vmatprep.mubr.msk.f32.mxu1 %vm8225_vm9, %v9466_v60  ;;  %v8092_v32 = vld [vmem:[%s9693_s1] sm:$0xff] }
 0x970   :  { %7771 = vmatprep.subr.bf16.mxu1 %v9721_v33 }
 0x977   :  { %7773 = vmatpush3.bf16.xpose.msra.mxu1 %v9185_v5 }
 0x978   :  { %7774 = vmatprep.subr.bf16.mxu1 %v9721_v33 }
 0x97e   :  { %7335 = vmatmul.mubr.f32.vlgmr.msra.gmra.mrb[6].mxu1 %v9448_v13 }
 0x97f   :  { %7776 = vmatpush3.bf16.xpose.msra.mxu1 %v8983_v56  ;;  %7345 = vmatprep.mubr.msk.f32.mxu1 %vm8225_vm9, %v9466_v60 }
 0x980   :  { %v4468_v41 = vpop.permute.xlu0 %4467  ;;  %7777 = vmatprep.subr.bf16.mxu1 %v9721_v33 }
 0x981   :  { %v4537_v40 = vmul.f32 %v8091_v9, %v4468_v41  ;;  %v4465_v54 = vpop.permute.xlu1 %4464  ;;  %v4494_v0 = vrot.slane %v4468_v41, %v8529_v27 }
 0x982   :  { %v4536_v5 = vmul.f32 %v8092_v32, %v4465_v54  ;;  %v4490_v22 = vrot.slane %v4465_v54, %v8529_v27 }
 0x983   :  { %v4551_v24 = vsel %vm146_vm0, %v4537_v40, 0.0 }
 0x984   :  { %v4544_v10 = vsel %vm146_vm0, %v4536_v5, 0.0  ;;  %v9509_v43 = vpop.permute.xlu0 %4485  ;;  %v4552_v8 = vrot.slane %v4551_v24, 4 }
 0x985   :  { %v4471_v56 = vpop.permute.xlu1 %4470  ;;  %v4545_v2 = vrot.slane %v4544_v10, 4  ;;  %v4543_v46 = vmul.f32 %v8094_v14, %v9509_v43 }
 0x986   :  { %v4538_v44 = vmul.f32 %v8093_v18, %v4471_v56  ;;  %v4498_v40 = vrot.slane %v4471_v56, %v8529_v27  ;;  %v8097_v18 = vld [vmem:[%s9693_s1 + $0x28] sm:$0xff] }
 0x987   :  { %7779 = vmatpush3.bf16.xpose.msra.mxu1 %v9019_v50  ;;  %v4553_v50 = vadd.f32 %v4552_v8, %v4551_v24  ;;  %v4546_v4 = vadd.f32 %v4545_v2, %v4544_v10  ;;  %v4593_v63 = vsel %vm146_vm0, %v4543_v46, 0.0  ;;  %v4519_v8 = vsel %vm1355_vm1, %v4494_v0, %v4490_v22 }
 0x988   :  { %v4558_v59 = vsel %vm146_vm0, %v4538_v44, 0.0  ;;  %7816 = vmatprep.subr.bf16.mxu1 %v9721_v33  ;;  %v4594_v9 = vrot.slane %v4593_v63, 4  ;;  %v4518_v22 = vrot.slane %v9509_v43, %v8529_v27 }
 0x989   :  { %v4474_v1 = vpop.permute.xlu1 %4473  ;;  %v4559_v45 = vrot.slane %v4558_v59, 4  ;;  %v4554_v19 = vrot.slane %v4553_v50, 2  ;;  %v4547_v32 = vrot.slane %v4546_v4, 2 }
 0x98a   :  { %v4539_v29 = vmul.f32 %v8095_v11, %v4474_v1  ;;  %v4502_v5 = vrot.slane %v4474_v1, %v8529_v27  ;;  %v4595_v46 = vadd.f32 %v4594_v9, %v4593_v63  ;;  %v4520_v1 = vsel %vm1357_vm2, %v4498_v40, %v4519_v8 }
 0x98b   :  { %v4560_v21 = vadd.f32 %v4559_v45, %v4558_v59  ;;  %v4555_v14 = vadd.f32 %v4554_v19, %v4553_v50  ;;  %v4548_v11 = vadd.f32 %v4547_v32, %v4546_v4  ;;  %v8098_v50 = vld [vmem:[%s9693_s1 + $0x30] sm:$0xff] }
 0x98c   :  { %v4565_v31 = vsel %vm146_vm0, %v4539_v29, 0.0  ;;  %v4521_v29 = vsel %vm1359_vm3, %v4502_v5, %v4520_v1 }
 0x98d   :  { %v4566_v6 = vrot.slane %v4565_v31, 4  ;;  %v4477_v34 = vpop.permute.xlu1 %4476  ;;  %v4561_v54 = vrot.slane %v4560_v21, 2  ;;  %v4556_v40 = vrot.slane %v4555_v14, 1  ;;  %v4549_v5 = vrot.slane %v4548_v11, 1 }
 0x98e   :  { %7346 = vmatmul.mubr.f32.vlgmr.msra.gmra.mrb[6].mxu1 %v9448_v13  ;;  %v4540_v17 = vmul.f32 %v8096_v16, %v4477_v34  ;;  %v4506_v10 = vrot.slane %v4477_v34, %v8529_v27 }
 0x98f   :  { %v4567_v20 = vadd.f32 %v4566_v6, %v4565_v31  ;;  %7818 = vmatpush3.bf16.msra.mxu1 %v9268_v48  ;;  %7422 = vmatprep.mubr.msk.f32.mxu1 %vm8225_vm9, %v9466_v60  ;;  %v4562_v16 = vadd.f32 %v4561_v54, %v4560_v21  ;;  %v4557_v8 = vadd.f32 %v4556_v40, %v4555_v14 }
 0x990   :  { %v4572_v13 = vsel %vm146_vm0, %v4540_v17, 0.0  ;;  %7819 = vmatprep.subr.bf16.mxu1 %v9721_v33  ;;  %v4522_v17 = vsel %vm1361_vm4, %v4506_v10, %v4521_v29 }
 0x991   :  { %v4573_v41 = vrot.slane %v4572_v13, 4  ;;  %v4480_v24 = vpop.permute.xlu1 %4479  ;;  %v4568_v56 = vrot.slane %v4567_v20, 2  ;;  %v4563_v10 = vrot.slane %v4562_v16, 1 }
 0x992   :  { %v4541_v44 = vmul.f32 %v8097_v18, %v4480_v24  ;;  %v4510_v2 = vrot.slane %v4480_v24, %v8529_v27 }
 0x993   :  { %v4574_v59 = vadd.f32 %v4573_v41, %v4572_v13  ;;  %7821 = vmatpush3.bf16.msra.mxu1 %v9271_v38  ;;  %v4569_v19 = vadd.f32 %v4568_v56, %v4567_v20  ;;  %v4596_v41 = vrot.slane %v4595_v46, 2  ;;  %v4550_v56 = vadd.f32 %v4549_v5, %v4548_v11 }
 0x994   :  { %v4579_v45 = vsel %vm146_vm0, %v4541_v44, 0.0  ;;  %7822 = vmatprep.subr.bf16.mxu1 %v9721_v33  ;;  %v4523_v4 = vsel %vm1363_vm5, %v4510_v2, %v4522_v17  ;;  %v4564_v1 = vadd.f32 %v4563_v10, %v4562_v16 }
 0x995   :  { %v4575_v31 = vrot.slane %v4574_v59, 2  ;;  %v4580_v6 = vrot.slane %v4579_v45, 4  ;;  %v4483_v34 = vpop.permute.xlu1 %4482 }
 0x996   :  { %v4514_v0 = vrot.slane %v4483_v34, %v8529_v27  ;;  %v4542_v63 = vmul.f32 %v8098_v50, %v4483_v34  ;;  %v4570_v27 = vrot.slane %v4569_v19, 1  ;;  %v4619_v34 = vsel %vm1355_vm1, %v4557_v8, %v4550_v56 }
 0x997   :  { %v4581_v9 = vadd.f32 %v4580_v6, %v4579_v45  ;;  %v4576_v13 = vadd.f32 %v4575_v31, %v4574_v59  ;;  %v4597_v59 = vadd.f32 %v4596_v41, %v4595_v46  ;;  %v4620_v50 = vsel %vm1357_vm2, %v4564_v1, %v4619_v34  ;;  %v9737_v1 = vld [vmem:[#allocation17_spill] sm:$0xff] }
 0x998   :  { %v4524_v21 = vsel %vm1365_vm6, %v4514_v0, %v4523_v4  ;;  %v4586_v32 = vsel %vm146_vm0, %v4542_v63, 0.0  ;;  %v4571_v29 = vadd.f32 %v4570_v27, %v4569_v19 }
 0x999   :  { %v4582_v24 = vrot.slane %v4581_v9, 2  ;;  %v4525_v54 = vsel %vm1367_vm7, %v4518_v22, %v4524_v21  ;;  %v4587_v18 = vrot.slane %v4586_v32, 4  ;;  %v4577_v20 = vrot.slane %v4576_v13, 1 }
 0x99a   :  { %4527 = vst.msk [vmem:[#allocation10 + $0x20] sm:$0xff] %vm1370_vm8, %v4525_v54  ;;  %v4598_v17 = vrot.slane %v4597_v59, 1  ;;  %v4621_v22 = vsel %vm1359_vm3, %v4571_v29, %v4620_v50 }
 0x99b   :  { %v4583_v43 = vadd.f32 %v4582_v24, %v4581_v9  ;;  %v4588_v44 = vadd.f32 %v4587_v18, %v4586_v32  ;;  %v4578_v31 = vadd.f32 %v4577_v20, %v4576_v13 }
 0x99c   :  { %v4599_v11 = vadd.f32 %v4598_v17, %v4597_v59 }
 0x99d   :  { %v4584_v2 = vrot.slane %v4583_v43, 1  ;;  %v4589_v45 = vrot.slane %v4588_v44, 2  ;;  %v4622_v4 = vsel %vm1361_vm4, %v4578_v31, %v4621_v22 }
 0x99f   :  { %v4590_v6 = vadd.f32 %v4589_v45, %v4588_v44  ;;  %v4585_v0 = vadd.f32 %v4584_v2, %v4583_v43  ;;  %v9738_v45 = vld [vmem:[#allocation18_spill] sm:$0xff] }
 0x9a1   :  { %v4591_v63 = vrot.slane %v4590_v6, 1  ;;  %v4623_v46 = vsel %vm1363_vm5, %v4585_v0, %v4622_v4 }
 0x9a3   :  { %v4592_v14 = vadd.f32 %v4591_v63, %v4590_v6 }
 0x9a5   :  { %v4624_v16 = vsel %vm1365_vm6, %v4592_v14, %v4623_v46 }
 0x9a6   :  { %v4625_v19 = vsel %vm1367_vm7, %v4599_v11, %v4624_v16 }
 0x9a7   :  { %v4626_v9 = vsel %vm146_vm0, %v4625_v19, 0 }
 0x9a8   :  { %v4697_v40 = vand.u32 4294901760, %v4626_v9 }
 0x9aa   :  { %v4698_v13 = vsub.f32 %v4626_v9, %v4697_v40 }
 0x9ac   :  { %v4699_v21 = vand.u32 4294901760, %v4698_v13 }
 0x9ae   :  { %v4700_v32 = vsub.f32 %v4698_v13, %v4699_v21 }
 0x9b0   :  { %v4701_v5 = vand.u32 4294901760, %v4700_v32 }
 0x9b2   :  { %7225 = vmatmul.mubr.f32.vlgmr.msra.gmra.mrb[6].mxu0 %v4701_v5 }
 0x9b3   :  { %7716 = vmatpush3.bf16.msra.mxu0 %v9453_v51  ;;  %7235 = vmatprep.mubr.msk.f32.mxu0 %vm8225_vm9, %v9466_v60 }
 0x9b4   :  { %7717 = vmatprep.subr.bf16.mxu0 %v9721_v33 }
 0x9b7   :  { %7719 = vmatpush3.bf16.msra.mxu0 %v9459_v26 }
 0x9b8   :  { %7720 = vmatprep.subr.bf16.mxu0 %v9721_v33 }
 0x9ba   :  { %7236 = vmatmul.mubr.f32.vlgmr.msra.gmra.mrb[6].mxu0 %v4697_v40 }
 0x9bb   :  { %7722 = vmatpush3.bf16.msra.mxu0 %v7721_v23  ;;  %7246 = vmatprep.mubr.msk.f32.mxu0 %vm8225_vm9, %v9466_v60 }
 0x9bc   :  { %7723 = vmatprep.subr.bf16.mxu0 %v9721_v33 }
 0x9bf   :  { %7725 = vmatpush3.bf16.msra.mxu0 %v7724_v61 }
 0x9c0   :  { %7726 = vmatprep.subr.bf16.mxu0 %v9721_v33 }
 0x9c2   :  { %7247 = vmatmul.mubr.f32.vlgmr.msra.gmra.mrb[6].mxu0 %v4698_v13 }
 0x9c3   :  { %7728 = vmatpush3.bf16.msra.mxu0 %v9418_v49  ;;  %7257 = vmatprep.mubr.msk.f32.mxu0 %vm8225_vm9, %v9466_v60 }
 0x9c4   :  { %7729 = vmatprep.subr.bf16.mxu0 %v9721_v33 }
 0x9c7   :  { %v1181_v25 = vpop.xlane.xlu1 %1180  ;;  %7731 = vmatpush3.bf16.msra.mxu0 %v9429_v30 }
 0x9c8   :  { %v1182_v3 = vsub.f32 %v9446_v62, %v1181_v25  ;;  %7732 = vmatprep.subr.bf16.mxu0 %v9721_v33 }
 0x9ca   :  { %v1183_v51 = vmul.f32 1.442695, %v1182_v3  ;;  %7258 = vmatmul.mubr.f32.vlgmr.msra.gmra.mrb[6].mxu0 %v4699_v21 }
 0x9cb   :  { %7734 = vmatpush3.bf16.msra.mxu0 %v9473_v28  ;;  %7268 = vmatprep.mubr.msk.f32.mxu0 %vm8225_vm9, %v9466_v60  ;;  %v6615_v28 = vld [vmem:[%s9699_s7] ss:$0 sm:$0xff]  ;;  %s8227_s7 = smov [#allocation10]  }
 0x9cc   :  { %8078 = vpow2.f32 %v1183_v51  ;;  %7735 = vmatprep.subr.bf16.mxu0 %v9721_v33  ;;  %s6603_s23 = sshll.u32 %s8227_s7, 4  ;;  %s6604_s23 = int_to_ptr.vmem [resolvable:$true] %s6603_s23 }
 0x9cd   :  { %s8187_s5 = scalar_lea.vmem %s6604_s23, 1024  ;;  %p8192_p5 = scmp.lt.s32.totalorder %s6604_s23, %s6604_s23 }
 0x9ce   :  { %p8188_p4 = scmp.ne.s32.totalorder %s6604_s23, %s8187_s5  ;;  %p8193_p6 = scmp.lt.s32.totalorder %s8187_s5, %s8187_s5 }
 0x9cf   :  { %7737 = vmatpush3.bf16.msra.mxu0 %v9475_v52 }
 0x9d0   :  { %7738 = vmatprep.subr.bf16.mxu0 %v9721_v33  ;;  %p8194_p7 = por %p8193_p6, %p8192_p5 }
 0x9d2   :  { %7269 = vmatmul.mubr.f32.vlgmr.msra.gmra.mrb[6].mxu0 %v4697_v40  ;;  %p8195_p8 = pnand %p8194_p7, %p8188_p4 }
 0x9d3   :  { %7740 = vmatpush3.bf16.msra.mxu0 %v9418_v49  ;;  %7279 = vmatprep.mubr.msk.f32.mxu0 %vm8225_vm9, %v9466_v60  ;;  %v8226_v49 = vmov 1  }
 0x9d4   :  { %7741 = vmatprep.subr.bf16.mxu0 %v9721_v33  ;;  %7970 = vset.pattern.permute.xlu1 %v8226_v49 }
 0x9d6   :  { %v8079_v7 = vpop.eup %8078 }
 0x9d7   :  { %v1185_v12 = vsel %vm1178_vm11, %v8079_v7, 0.0  ;;  %7743 = vmatpush3.bf16.msra.mxu0 %v9429_v30 }
 0x9d8   :  { %1186 = vadd.xlane.f32.xlu0 %v1185_v12  ;;  %7780 = vmatprep.subr.bf16.mxu0 %v9721_v33 }
 0x9da   :  { %7280 = vmatmul.mubr.f32.vlgmr.msra.gmra.mrb[6].mxu0 %v4697_v40 }
 0x9db   :  { %7356 = vmatprep.mubr.msk.f32.mxu0 %vm8225_vm9, %v9466_v60 }
 0x9e0   :  { %7782 = vmatpush3.bf16.xpose.msra.mxu0 %v8998_v39 }
 0x9e1   :  { %7783 = vmatprep.subr.bf16.mxu0 %v9721_v33 }
 0x9e8   :  { %7785 = vmatpush3.bf16.xpose.msra.mxu0 %v9027_v58 }
 0x9e9   :  { %7786 = vmatprep.subr.bf16.mxu0 %v9721_v33 }
 0xa61   :  { %v5604_v62 = vpop.f32.mrb[6].mxu1 }
 0xa62   :  { %v7347_v26 = vpop.f32.mrb[7].mxu1 }
 0xa65   :  { %v1187_v30 = vpop.xlane.xlu0 %1186 }
 0xa66   :  { %8080 = vrcp.f32 %v1187_v30 }
 0xa70   :  { %v8081_v23 = vpop.eup %8080 }
 0xa71   :  { %v1189_v61 = vmul.f32 %v8081_v23, %v8079_v7 }
 0xa73   :  { %6590 = vperm.xlu1 %7970, %v1189_v61   ;;  %6596 = vst.msk [vmem:[#allocation10 + $0x38] sm:$0xff] %vm1178_vm11, %v1189_v61  ;;  %3938 = vperm.xlu0 %7969, %v1189_v61  }
 0xa77   :  { %7971 = vset.pattern.permute.xlu0 %v8226_v49 }
 0xaad   :  { %v5109_v52 = vpop.f32.mrb[6].mxu0 }
 0xaae   :  { %v7856_v41 = vadd.f32 %v6615_v28, %v5109_v52  ;;  %v7281_v24 = vpop.f32.mrb[7].mxu0 }
 0xab0   :  { %v5113_v54 = vsub.f32 0.0, %v7856_v41 }
 0xab2   :  { %v5114_v10 = vmul.f32 1.442695, %v5113_v54 }
 0xab4   :  { %8082 = vpow2.f32 %v5114_v10 }
 0xabe   :  { %v8083_v18 = vpop.eup %8082 }
 0xabf   :  { %v5116_v27 = vadd.f32 1.0, %v8083_v18 }
 0xac1   :  { %8084 = vrcp.f32 %v5116_v27 }
 0xacb   :  { %v8085_v43 = vpop.eup %8084 }
 0xacc   :  { %5119 = vst.msk [vmem:[#allocation10 + $0x30] sm:$0xff] %vm1370_vm8, %v8085_v43  ;;  %v5609_v20 = vsel %vm1370_vm8, %v8085_v43, 0 }
 0xacd   :  { %v5680_v44 = vand.u32 4294901760, %v5609_v20 }
 0xacf   :  { %v5681_v8 = vsub.f32 %v5609_v20, %v5680_v44 }
 0xad1   :  { %v5682_v56 = vand.u32 4294901760, %v5681_v8 }
 0xad3   :  { %v5683_v59 = vsub.f32 %v5681_v8, %v5682_v56 }
 0xad5   :  { %v5684_v2 = vand.u32 4294901760, %v5683_v59 }
 0xad7   :  { %7357 = vmatmul.mubr.f32.vlgmr.msra.gmra.mrb[8].mxu0 %v5684_v2 }
 0xad8   :  { %7788 = vmatpush3.bf16.xpose.msra.mxu0 %v9063_v37  ;;  %7367 = vmatprep.mubr.msk.f32.mxu0 %vm8225_vm9, %v9466_v60  ;;  %v9739_v37 = vld [vmem:[#allocation19_spill] sm:$0xff] }
 0xad9   :  { %7789 = vmatprep.subr.bf16.mxu0 %v9721_v33 }
 0xae0   :  { %7791 = vmatpush3.bf16.xpose.msra.mxu0 %v9094_v42  ;;  %v9740_v42 = vld [vmem:[#allocation20_spill] sm:$0xff] }
 0xae1   :  { %7792 = vmatprep.subr.bf16.mxu0 %v9721_v33 }
 0xae7   :  { %7368 = vmatmul.mubr.f32.vlgmr.msra.gmra.mrb[8].mxu0 %v5680_v44 }
 0xae8   :  { %7794 = vmatpush3.bf16.xpose.msra.mxu0 %v9737_v1  ;;  %7378 = vmatprep.mubr.msk.f32.mxu0 %vm8225_vm9, %v9466_v60 }
 0xae9   :  { %7795 = vmatprep.subr.bf16.mxu0 %v9721_v33 }
 0xaf0   :  { %7797 = vmatpush3.bf16.xpose.msra.mxu0 %v9738_v45 }
 0xaf1   :  { %7798 = vmatprep.subr.bf16.mxu0 %v9721_v33 }
 0xaf7   :  { %7379 = vmatmul.mubr.f32.vlgmr.msra.gmra.mrb[8].mxu0 %v5681_v8 }
 0xaf8   :  { %7800 = vmatpush3.bf16.xpose.msra.mxu0 %v8998_v39  ;;  %7389 = vmatprep.mubr.msk.f32.mxu0 %vm8225_vm9, %v9466_v60 }
 0xaf9   :  { %7801 = vmatprep.subr.bf16.mxu0 %v9721_v33 }
 0xb00   :  { %7803 = vmatpush3.bf16.xpose.msra.mxu0 %v9027_v58 }
 0xb01   :  { %7804 = vmatprep.subr.bf16.mxu0 %v9721_v33 }
 0xb07   :  { %7390 = vmatmul.mubr.f32.vlgmr.msra.gmra.mrb[8].mxu0 %v5682_v56 }
 0xb08   :  { %7806 = vmatpush3.bf16.xpose.msra.mxu0 %v9739_v37  ;;  %7400 = vmatprep.mubr.msk.f32.mxu0 %vm8225_vm9, %v9466_v60 }
 0xb09   :  { %7807 = vmatprep.subr.bf16.mxu0 %v9721_v33 }
 0xb10   :  { %7809 = vmatpush3.bf16.xpose.msra.mxu0 %v9740_v42 }
 0xb11   :  { %7810 = vmatprep.subr.bf16.mxu0 %v9721_v33 }
 0xb17   :  { %7401 = vmatmul.mubr.f32.vlgmr.msra.gmra.mrb[8].mxu0 %v5680_v44 }
 0xb18   :  { %7812 = vmatpush3.bf16.xpose.msra.mxu0 %v8998_v39  ;;  %7411 = vmatprep.mubr.msk.f32.mxu0 %vm8225_vm9, %v9466_v60 }
 0xb19   :  { %7813 = vmatprep.subr.bf16.mxu0 %v9721_v33 }
 0xb20   :  { %7815 = vmatpush3.bf16.xpose.msra.mxu0 %v9027_v58 }
 0xb27   :  { %7412 = vmatmul.mubr.f32.vlgmr.msra.gmra.mrb[8].mxu0 %v5680_v44 }
 0xbfa   :  { %v6092_v29 = vpop.f32.mrb[8].mxu0 }
 0xbfb   :  { %v6096_v31 = vmul.f32 %v6092_v29, %v5604_v62  ;;  %v7413_v6 = vpop.f32.mrb[9].mxu0 }
 0xbfd   :  { %v6098_v34 = vsel %vm146_vm0, %v6096_v31, 0 }
 0xbfe   :  { %v6169_v17 = vand.u32 4294901760, %v6098_v34 }
 0xc00   :  { %v6170_v0 = vsub.f32 %v6098_v34, %v6169_v17 }
 0xc02   :  { %v6171_v50 = vand.u32 4294901760, %v6170_v0 }
 0xc04   :  { %v6172_v63 = vsub.f32 %v6170_v0, %v6171_v50 }
 0xc06   :  { %v6173_v22 = vand.u32 4294901760, %v6172_v63 }
 0xc08   :  { %7423 = vmatmul.mubr.f32.vlgmr.msra.gmra.mrb[8].mxu1 %v6173_v22 }
 0xc09   :  { %7824 = vmatpush3.bf16.msra.mxu1 %v9276_v36  ;;  %7433 = vmatprep.mubr.msk.f32.mxu1 %vm8225_vm9, %v9466_v60 }
 0xc0a   :  { %7825 = vmatprep.subr.bf16.mxu1 %v9721_v33 }
 0xc0d   :  { %7827 = vmatpush3.bf16.msra.mxu1 %v9283_v53  ;;  %v3939_v53 = vpop.permute.xlu0 %3938 }
 0xc0e   :  { %7828 = vmatprep.subr.bf16.mxu1 %v9721_v33 }
 0xc10   :  { %7434 = vmatmul.mubr.f32.vlgmr.msra.gmra.mrb[8].mxu1 %v6169_v17 }
 0xc11   :  { %7830 = vmatpush3.bf16.msra.mxu1 %v9278_v57  ;;  %7444 = vmatprep.mubr.msk.f32.mxu1 %vm8225_vm9, %v9466_v60 }
 0xc12   :  { %7831 = vmatprep.subr.bf16.mxu1 %v9721_v33 }
 0xc15   :  { %7833 = vmatpush3.bf16.msra.mxu1 %v9285_v35 }
 0xc16   :  { %7834 = vmatprep.subr.bf16.mxu1 %v9721_v33 }
 0xc18   :  { %7445 = vmatmul.mubr.f32.vlgmr.msra.gmra.mrb[8].mxu1 %v6170_v0 }
 0xc19   :  { %7836 = vmatpush3.bf16.msra.mxu1 %v9268_v48  ;;  %7455 = vmatprep.mubr.msk.f32.mxu1 %vm8225_vm9, %v9466_v60 }
 0xc1a   :  { %7837 = vmatprep.subr.bf16.mxu1 %v9721_v33 }
 0xc1d   :  { %7839 = vmatpush3.bf16.msra.mxu1 %v9271_v38 }
 0xc1e   :  { %7840 = vmatprep.subr.bf16.mxu1 %v9721_v33 }
 0xc20   :  { %7456 = vmatmul.mubr.f32.vlgmr.msra.gmra.mrb[8].mxu1 %v6171_v50 }
 0xc21   :  { %7842 = vmatpush3.bf16.msra.mxu1 %v9295_v55  ;;  %7466 = vmatprep.mubr.msk.f32.mxu1 %vm8225_vm9, %v9466_v60  ;;  %v6591_v55 = vpop.permute.xlu1 %6590 }
 0xc22   :  { %7843 = vmatprep.subr.bf16.mxu1 %v9721_v33 }
 0xc25   :  { %7845 = vmatpush3.bf16.msra.mxu1 %v9298_v47 }
 0xc26   :  { %7846 = vmatprep.subr.bf16.mxu1 %v9721_v33 }
 0xc28   :  { %7467 = vmatmul.mubr.f32.vlgmr.msra.gmra.mrb[8].mxu1 %v6169_v17 }
 0xc29   :  { %7848 = vmatpush3.bf16.msra.mxu1 %v9268_v48  ;;  %7477 = vmatprep.mubr.msk.f32.mxu1 %vm8225_vm9, %v9466_v60  ;;  %v3941_v48 = vmul.f32 %v3939_v53, %v9435_v15 }
 0xc2a   :  { %7849 = vmatprep.subr.bf16.mxu1 %v9721_v33 }
 0xc2d   :  { %7851 = vmatpush3.bf16.msra.mxu1 %v9271_v38 }
 0xc30   :  { %7478 = vmatmul.mubr.f32.vlgmr.msra.gmra.mrb[8].mxu1 %v6169_v17 }
 0xd03   :  { %v6581_v39 = vpop.f32.mrb[8].mxu1 }
 0xd04   :  { %v6585_v58 = vmax.f32 %v6581_v39, 1.0  ;;  %v7479_v57 = vpop.f32.mrb[9].mxu1 }
 0xd06   :  { %8086 = vrcp.f32 %v6585_v58 }
 0xd10   :  { %v8087_v36 = vpop.eup %8086 }
 0xd11   :  { %v6587_v35 = vmul.f32 %v8087_v36, %v6581_v39 }
 0xd13   :  { %6588 = vst.msk [vmem:[#allocation10 + $0x10] sm:$0xff] %vm2442_vm10, %v6587_v35  ;;  %v6593_v47 = vmul.f32 %v6591_v55, %v6587_v35 }
 0xd15   :  { %v6594_v60 = vadd.f32 %v6593_v47, %v3941_v48 }
 0xd17   :  { %6595 = vst.msk [vmem:[#allocation10] sm:$0xff] %vm2442_vm10, %v6594_v60 }
 0xd18   :  { %8198 = shalt.err (!%p8195_p8)
}
 0xd19   :  { %s8199_s4 = scalar_lea.hbm %s9703_s11, 1024 }
 0xd1a   :  { %p8200_p9 = scmp.ne.s32.totalorder %s9703_s11, %s8199_s4  ;;  %p8203_p10 = scmp.lt.u32.totalorder %s8199_s4, %s9703_s11 }
 0xd1c   :  { %p8205_p11 = pnand %p8203_p10, %p8200_p9 }
 0xd1e   :  { %8208 = shalt.err (!%p8205_p11)
}
 0xd1f   :  { %6606 = dma.vmem_to_hbm [thread:$0]  %s6604_s23, 1024, %s9703_s11, [#allocation4]  }
 0xd20   :  { %8215 = dma.done.wait [#allocation4], 1024  }
 0xd21   :  { %8216 = vsyncadd [#allocation4], 4294966272 }
 0xd22   :  { %6610 = vsyncpa [#allocation3], 1 }
 0xd23   :  { %6611 = vsyncpa [#allocation6], 1 }
 0xd24   :  { %6612 = vsyncpa [#allocation9], 1 }
 0xd25   :  { %6613 = vsyncpa [#allocation4], 1 }

</bundles_post_ra>
